<compile_context>
chip_gen: v5e
topology: v5e:2x2
jax: 0.10.0
libtpu: 0.0.40
codegen_flags: <defaults>
</compile_context>

<pallas_src>
import functools

import jax
import jax.numpy as jnp
from jax.experimental import pallas as pl
from jax.experimental.pallas import tpu as pltpu

KW = 4              # conv kernel size
PAD = 1             # conv padding
BN_EPS = 1e-5
LRELU_SLOPE = 0.2

TM_MAX = 256                      # M tile (rows).  256 keeps v7x (64 MiB VMEM) safe.
TK_MAX = 1024                     # K tile (contraction).
VMEM_LIMIT_BYTES = 64 * 1024 * 1024


def _round_up(x, m):
    return (x + m - 1) // m * m


# ---------------------------------------------------------------------------
# Pallas kernels
# ---------------------------------------------------------------------------
def _matmul_bias_act_kernel(p_ref, w_ref, b_ref, o_ref, acc_ref, *, has_act):
    """Tiled  y = patches @ W + b  (+ LeakyReLU).  Grid = (M tiles, K tiles)."""
    k = pl.program_id(1)

    @pl.when(k == 0)
    def _():
        acc_ref[...] = jnp.zeros_like(acc_ref)

    acc_ref[...] += jnp.dot(p_ref[...], w_ref[...],
                            preferred_element_type=jnp.float32)

    @pl.when(k == pl.num_programs(1) - 1)
    def _():
        y = acc_ref[...] + b_ref[...]
        if has_act:
            y = jnp.where(y >= 0.0, y, LRELU_SLOPE * y)
        o_ref[...] = y.astype(o_ref.dtype)


def _matmul_stats_kernel(p_ref, w_ref, o_ref, stats_ref, acc_ref):
    """Tiled  y = patches @ W  (no bias) + per-M-tile (sum, sumsq) partials.

    Grid = (M tiles, K tiles).  stats block = (1, 2, Cout_p): row 0 = sum(y),
    row 1 = sum(y*y) over this M tile (padded rows are exactly 0 so they do
    not perturb the statistics).
    """
    k = pl.program_id(1)

    @pl.when(k == 0)
    def _():
        acc_ref[...] = jnp.zeros_like(acc_ref)

    acc_ref[...] += jnp.dot(p_ref[...], w_ref[...],
                            preferred_element_type=jnp.float32)

    @pl.when(k == pl.num_programs(1) - 1)
    def _():
        y = acc_ref[...]
        o_ref[...] = y.astype(o_ref.dtype)
        s = jnp.sum(y, axis=0, keepdims=True)          # (1, Cout_p)
        ss = jnp.sum(y * y, axis=0, keepdims=True)     # (1, Cout_p)
        stats_ref[...] = jnp.concatenate([s, ss], axis=0)[None]


def _bn_act_kernel(y_ref, scale_ref, shift_ref, o_ref):
    """Tiled elementwise pass:  LeakyReLU(y * scale + shift)."""
    y = y_ref[...] * scale_ref[...] + shift_ref[...]
    o_ref[...] = jnp.where(y >= 0.0, y, LRELU_SLOPE * y).astype(o_ref.dtype)


# ---------------------------------------------------------------------------
# Plain-JAX glue: padding + im2col patch extraction (layout plumbing only)
# ---------------------------------------------------------------------------
def _im2col(x_nhwc, stride):
    """x_nhwc already spatially padded. Returns (patches (M, 16*C), N, Ho, Wo)."""
    n, hp, wp, c = x_nhwc.shape
    ho = (hp - KW) // stride + 1
    wo = (wp - KW) // stride + 1
    cols = []
    for i in range(KW):
        for j in range(KW):
            patch = x_nhwc[:, i:i + stride * ho:stride, j:j + stride * wo:stride, :]
            cols.append(patch)                                  # (N, Ho, Wo, C)
    patches = jnp.concatenate(cols, axis=-1)                    # (N, Ho, Wo, 16*C)
    return patches.reshape(n * ho * wo, KW * KW * c), n, ho, wo


# ---------------------------------------------------------------------------
# One conv (+ BN) (+ LeakyReLU) layer
# ---------------------------------------------------------------------------
def _conv_layer(x, p, cfg):
    stride, has_bias, has_bn, has_act = cfg
    x_pad = jnp.pad(x, ((0, 0), (PAD, PAD), (PAD, PAD), (0, 0)))
    patches, n, ho, wo = _im2col(x_pad, stride)        # bf16, (M, K)
    M, K = patches.shape
    cout_p = p["w"].shape[1]                           # already padded to 128-mult

    # --- tile plan (M "parallel", K "arbitrary" with f32 accumulator) ------
    tm = max(8, min(TM_MAX, _round_up(M, 8)))
    m_pad = _round_up(M, tm)
    k_pad = _round_up(K, 128)
    tk = min(TK_MAX, k_pad)
    k_pad = _round_up(k_pad, tk)
    num_m, num_k = m_pad // tm, k_pad // tk

    patches = jnp.pad(patches, ((0, m_pad - M), (0, k_pad - K)))
    w = jnp.pad(p["w"], ((0, k_pad - K), (0, 0)))      # constant-folded under jit

    cparams = pltpu.CompilerParams(
        dimension_semantics=("parallel", "arbitrary"),
        vmem_limit_bytes=VMEM_LIMIT_BYTES)

    if has_bn:
        # -- pass 1: matmul + per-tile sum / sum-of-squares --
        y, stats = pl.pallas_call(
            _matmul_stats_kernel,
            out_shape=(jax.ShapeDtypeStruct((m_pad, cout_p), jnp.float32),
                       jax.ShapeDtypeStruct((num_m, 2, cout_p), jnp.float32)),
            grid=(num_m, num_k),
            in_specs=[pl.BlockSpec((tm, tk), lambda m, k: (m, k)),
                      pl.BlockSpec((tk, cout_p), lambda m, k: (k, 0))],
            out_specs=(pl.BlockSpec((tm, cout_p), lambda m, k: (m, 0)),
                       pl.BlockSpec((1, 2, cout_p), lambda m, k: (m, 0, 0))),
            scratch_shapes=[pltpu.VMEM((tm, cout_p), jnp.float32)],
            compiler_params=cparams,
        )(patches, w)

        # -- tiny cross-tile reduction + fold BN into per-channel scale/shift --
        s = jnp.sum(stats[:, 0, :], axis=0)
        ss = jnp.sum(stats[:, 1, :], axis=0)
        count = jnp.float32(M)                               # real rows only
        mean = s / count
        var = jnp.maximum(ss / count - mean * mean, 0.0)     # biased var (BN train)
        inv = jax.lax.rsqrt(var + BN_EPS)
        scale = (p["gamma"] * inv)[None, :]
        shift = (p["beta"] - mean * p["gamma"] * inv)[None, :]

        # -- pass 2: scale/shift + LeakyReLU, tiled & parallel over M --
        out = pl.pallas_call(
            _bn_act_kernel,
            out_shape=jax.ShapeDtypeStruct((m_pad, cout_p), jnp.bfloat16),
            grid=(num_m,),
            in_specs=[pl.BlockSpec((tm, cout_p), lambda m: (m, 0)),
                      pl.BlockSpec((1, cout_p), lambda m: (0, 0)),
                      pl.BlockSpec((1, cout_p), lambda m: (0, 0))],
            out_specs=pl.BlockSpec((tm, cout_p), lambda m: (m, 0)),
            compiler_params=pltpu.CompilerParams(
                dimension_semantics=("parallel",),
                vmem_limit_bytes=VMEM_LIMIT_BYTES),
        )(y, scale, shift)
    else:
        # bias (+ optional LeakyReLU); bf16 output when it feeds another layer.
        out_dtype = jnp.bfloat16 if has_act else jnp.float32
        out = pl.pallas_call(
            functools.partial(_matmul_bias_act_kernel, has_act=has_act),
            out_shape=jax.ShapeDtypeStruct((m_pad, cout_p), out_dtype),
            grid=(num_m, num_k),
            in_specs=[pl.BlockSpec((tm, tk), lambda m, k: (m, k)),
                      pl.BlockSpec((tk, cout_p), lambda m, k: (k, 0)),
                      pl.BlockSpec((1, cout_p), lambda m, k: (0, 0))],
            out_specs=pl.BlockSpec((tm, cout_p), lambda m, k: (m, 0)),
            scratch_shapes=[pltpu.VMEM((tm, cout_p), jnp.float32)],
            compiler_params=cparams,
        )(patches, w, p["b"])

    cout = p["cout"]
    return out[:M, :cout].reshape(n, ho, wo, cout)


# ---------------------------------------------------------------------------
# Parameter construction (deterministic, synthetic)
# ---------------------------------------------------------------------------
def make_params(key, input_nc, ndf=64, n_layers=3):
    chans = [input_nc, ndf]
    nf_mult = 1
    for n in range(1, n_layers):
        nf_mult = min(2 ** n, 8)
        chans.append(ndf * nf_mult)
    nf_mult = min(2 ** n_layers, 8)
    chans.append(ndf * nf_mult)
    chans.append(1)

    # (stride, has_bias, has_bn, has_act) per layer — matches net/PatchGAN.py.
    configs = [(2, True, False, True)]
    for _ in range(n_layers):
        configs.append((1, False, True, True))
    configs.append((1, True, False, False))

    params = []
    for li, (cin, cout) in enumerate(zip(chans[:-1], chans[1:])):
        key, k_w, k_b = jax.random.split(key, 3)
        cout_p = _round_up(cout, 128)     # lane-dense outputs everywhere
        # PyTorch conv weight layout (Cout, Cin, KH, KW); synthetic init.
        w_pt = jax.random.normal(k_w, (cout, cin, KW, KW), jnp.float32) * 0.05
        # -> im2col layout (KH*KW*Cin, Cout), pad Cout, bf16 MXU operand.
        w_mat = jnp.transpose(w_pt, (2, 3, 1, 0)).reshape(KW * KW * cin, cout)
        w_mat = jnp.pad(w_mat, ((0, 0), (0, cout_p - cout))).astype(jnp.bfloat16)

        _, has_bias, has_bn, _ = configs[li]
        b = None
        if has_bias:
            b_r = jax.random.normal(k_b, (cout,), jnp.float32) * 0.05
            b = jnp.pad(b_r, (0, cout_p - cout)).reshape(1, cout_p)
        gamma = beta = None
        if has_bn:
            gamma = jnp.pad(jnp.ones((cout,), jnp.float32), (0, cout_p - cout))
            beta = jnp.zeros((cout_p,), jnp.float32)
        params.append(dict(w=w_mat, b=b, gamma=gamma, beta=beta, cout=cout))
    return params, configs


# ---------------------------------------------------------------------------
# Forward pass
# ---------------------------------------------------------------------------
def patchgan_dis_forward(x_nchw, params, configs):
    x = jnp.transpose(x_nchw, (0, 2, 3, 1)).astype(jnp.bfloat16)   # NHWC bf16
    for p, cfg in zip(params, configs):
        x = _conv_layer(x, p, cfg)
    return jnp.transpose(x, (0, 3, 1, 2))                          # NCHW (f32)


if __name__ == "__main__":
    key = jax.random.PRNGKey(0)
    k_x, k_p = jax.random.split(key)

    # Small shapes: batch=2, input_nc=4, spatial=16x16, ndf=8, n_layers=3
    INPUT_NC, NDF, N_LAYERS = 4, 8, 3
    x = jax.random.normal(k_x, (2, INPUT_NC, 16, 16), jnp.float32)

    params, configs = make_params(k_p, INPUT_NC, ndf=NDF, n_layers=N_LAYERS)

    fwd = jax.jit(lambda xx: patchgan_dis_forward(xx, params, configs))
    out = fwd(x)
    jax.block_until_ready(out)

    # Expected output spatial trace: 16 -(s2)-> 8 -> 7 -> 6 -> 5 -> 4, Cout=1
    assert out.shape == (2, 1, 4, 4), out.shape
    assert out.dtype == jnp.float32, out.dtype
    assert bool(jnp.all(jnp.isfinite(out)))
    print("KERNEL_OK")
</pallas_src>

<mosaic_0001>
module attributes {stable_mosaic.version = 11 : i64} {
  func.func @_matmul_bias_act_kernel(%arg0: i32, %arg1: i32, %arg2: memref<128x128xbf16, #tpu.memory_space<vmem>>, %arg3: memref<128x128xbf16, #tpu.memory_space<vmem>>, %arg4: memref<1x128xf32, #tpu.memory_space<vmem>>, %arg5: memref<128x128xbf16, #tpu.memory_space<vmem>>, %arg6: memref<128x128xf32, #tpu.memory_space<vmem>>) attributes {dimension_semantics = [#tpu.dimension_semantics<parallel>, #tpu.dimension_semantics<arbitrary>], iteration_bounds = array<i64: 1, 1>, scalar_prefetch = 0 : i64, scratch_operands = 1 : i64, tpu.core_type = #tpu.core_type<tc>, window_params = [{transform_indices = @transform_0, window_bounds = array<i64: 128, 128>}, {transform_indices = @transform_1, window_bounds = array<i64: 128, 128>}, {pipeline_mode = #tpu.pipeline_mode<synchronous>, transform_indices = @transform_2, window_bounds = array<i64: 1, 128>}, {transform_indices = @transform_3, window_bounds = array<i64: 128, 128>}]} {
    %c0_i32 = arith.constant 0 : i32
    %0 = arith.cmpi eq, %arg1, %c0_i32 : i32
    %1 = arith.extui %0 : i1 to i32
    %c0_i32_0 = arith.constant 0 : i32
    %2 = arith.cmpi ne, %1, %c0_i32_0 : i32
    scf.if %2 {
      %cst_10 = arith.constant 0.000000e+00 : f32
      %12 = vector.broadcast %cst_10 : f32 to vector<128x128xf32>
      %c0_11 = arith.constant 0 : index
      %c0_12 = arith.constant 0 : index
      %13 = vector.load %arg6[%c0_11, %c0_12] : memref<128x128xf32, #tpu.memory_space<vmem>>, vector<128x128xf32>
      tpu.vector_store %arg6[%c0_11, %c0_12], %12 {strides = array<i32>} : memref<128x128xf32, #tpu.memory_space<vmem>>, vector<128x128xf32>,
    } else {
    }
    %c0 = arith.constant 0 : index
    %c0_1 = arith.constant 0 : index
    %3 = vector.load %arg6[%c0, %c0_1] : memref<128x128xf32, #tpu.memory_space<vmem>>, vector<128x128xf32>
    %c0_2 = arith.constant 0 : index
    %c0_3 = arith.constant 0 : index
    %4 = vector.load %arg2[%c0_2, %c0_3] : memref<128x128xbf16, #tpu.memory_space<vmem>>, vector<128x128xbf16>
    %c0_4 = arith.constant 0 : index
    %c0_5 = arith.constant 0 : index
    %5 = vector.load %arg3[%c0_4, %c0_5] : memref<128x128xbf16, #tpu.memory_space<vmem>>, vector<128x128xbf16>
    %cst = arith.constant dense<0.000000e+00> : vector<128x128xf32>
    %6 = tpu.matmul %4, %5, %cst {dimension_numbers = #tpu.dot_dimension_numbers<[1], [0], [0], [1], [0, 0, 1, 1], [], []>} : vector<128x128xbf16>, vector<128x128xbf16>, vector<128x128xf32> -> vector<128x128xf32>
    %7 = arith.addf %3, %6 : vector<128x128xf32>
    %c0_6 = arith.constant 0 : index
    %c0_7 = arith.constant 0 : index
    %8 = vector.load %arg6[%c0_6, %c0_7] : memref<128x128xf32, #tpu.memory_space<vmem>>, vector<128x128xf32>
    tpu.vector_store %arg6[%c0_6, %c0_7], %7 {strides = array<i32>} : memref<128x128xf32, #tpu.memory_space<vmem>>, vector<128x128xf32>,
    %c0_i32_8 = arith.constant 0 : i32
    %9 = arith.cmpi eq, %arg1, %c0_i32_8 : i32
    %10 = arith.extui %9 : i1 to i32
    %c0_i32_9 = arith.constant 0 : i32
    %11 = arith.cmpi ne, %10, %c0_i32_9 : i32
    scf.if %11 {
      %c0_10 = arith.constant 0 : index
      %c0_11 = arith.constant 0 : index
      %12 = vector.load %arg6[%c0_10, %c0_11] : memref<128x128xf32, #tpu.memory_space<vmem>>, vector<128x128xf32>
      %c0_12 = arith.constant 0 : index
      %c0_13 = arith.constant 0 : index
      %13 = vector.load %arg4[%c0_12, %c0_13] : memref<1x128xf32, #tpu.memory_space<vmem>>, vector<1x128xf32>
      %14 = vector.broadcast %13 : vector<1x128xf32> to vector<128x128xf32>
      %15 = arith.addf %12, %14 : vector<128x128xf32>
      %cst_14 = arith.constant 0.000000e+00 : f32
      %16 = vector.broadcast %cst_14 : f32 to vector<128x128xf32>
      %17 = arith.cmpf oge, %15, %16 : vector<128x128xf32>
      %cst_15 = arith.constant 2.000000e-01 : f32
      %18 = vector.broadcast %cst_15 : f32 to vector<128x128xf32>
      %19 = arith.mulf %18, %15 : vector<128x128xf32>
      %20 = arith.select %17, %15, %19 : vector<128x128xi1>, vector<128x128xf32>
      %21 = arith.truncf %20 : vector<128x128xf32> to vector<128x128xbf16>
      %c0_16 = arith.constant 0 : index
      %c0_17 = arith.constant 0 : index
      %22 = vector.load %arg5[%c0_16, %c0_17] : memref<128x128xbf16, #tpu.memory_space<vmem>>, vector<128x128xbf16>
      tpu.vector_store %arg5[%c0_16, %c0_17], %21 {strides = array<i32>} : memref<128x128xbf16, #tpu.memory_space<vmem>>, vector<128x128xbf16>,
    } else {
    }
    return
  }
  func.func @transform_0(%arg0: i32, %arg1: i32) -> (i32, i32) {
    %c0_i32 = arith.constant 0 : i32
    return %arg0, %arg1 : i32, i32
  }
  func.func @transform_1(%arg0: i32, %arg1: i32) -> (i32, i32) {
    %c0_i32 = arith.constant 0 : i32
    %c0_i32_0 = arith.constant 0 : i32
    return %arg1, %c0_i32 : i32, i32
  }
  func.func @transform_2(%arg0: i32, %arg1: i32) -> (i32, i32) {
    %c0_i32 = arith.constant 0 : i32
    %c0_i32_0 = arith.constant 0 : i32
    %c0_i32_1 = arith.constant 0 : i32
    return %c0_i32, %c0_i32_0 : i32, i32
  }
  func.func @transform_3(%arg0: i32, %arg1: i32) -> (i32, i32) {
    %c0_i32 = arith.constant 0 : i32
    %c0_i32_0 = arith.constant 0 : i32
    return %arg0, %c0_i32 : i32, i32
  }
}

module attributes {stable_mosaic.version = 11 : i64} {
  func.func @_matmul_stats_kernel(%arg0: i32, %arg1: i32, %arg2: memref<104x128xbf16, #tpu.memory_space<vmem>>, %arg3: memref<128x128xbf16, #tpu.memory_space<vmem>>, %arg4: memref<104x128xf32, #tpu.memory_space<vmem>>, %arg5: memref<1x2x128xf32, #tpu.memory_space<vmem>>, %arg6: memref<104x128xf32, #tpu.memory_space<vmem>>) attributes {dimension_semantics = [#tpu.dimension_semantics<parallel>, #tpu.dimension_semantics<arbitrary>], iteration_bounds = array<i64: 1, 1>, scalar_prefetch = 0 : i64, scratch_operands = 1 : i64, tpu.core_type = #tpu.core_type<tc>, window_params = [{transform_indices = @transform_0, window_bounds = array<i64: 104, 128>}, {transform_indices = @transform_1, window_bounds = array<i64: 128, 128>}, {transform_indices = @transform_2, window_bounds = array<i64: 104, 128>}, {transform_indices = @transform_3, window_bounds = array<i64: 1, 2, 128>}]} {
    %c0_i32 = arith.constant 0 : i32
    %0 = arith.cmpi eq, %arg1, %c0_i32 : i32
    %1 = arith.extui %0 : i1 to i32
    %c0_i32_0 = arith.constant 0 : i32
    %2 = arith.cmpi ne, %1, %c0_i32_0 : i32
    scf.if %2 {
      %cst_10 = arith.constant 0.000000e+00 : f32
      %12 = vector.broadcast %cst_10 : f32 to vector<104x128xf32>
      %c0_11 = arith.constant 0 : index
      %c0_12 = arith.constant 0 : index
      %13 = vector.load %arg6[%c0_11, %c0_12] : memref<104x128xf32, #tpu.memory_space<vmem>>, vector<104x128xf32>
      tpu.vector_store %arg6[%c0_11, %c0_12], %12 {strides = array<i32>} : memref<104x128xf32, #tpu.memory_space<vmem>>, vector<104x128xf32>,
    } else {
    }
    %c0 = arith.constant 0 : index
    %c0_1 = arith.constant 0 : index
    %3 = vector.load %arg6[%c0, %c0_1] : memref<104x128xf32, #tpu.memory_space<vmem>>, vector<104x128xf32>
    %c0_2 = arith.constant 0 : index
    %c0_3 = arith.constant 0 : index
    %4 = vector.load %arg2[%c0_2, %c0_3] : memref<104x128xbf16, #tpu.memory_space<vmem>>, vector<104x128xbf16>
    %c0_4 = arith.constant 0 : index
    %c0_5 = arith.constant 0 : index
    %5 = vector.load %arg3[%c0_4, %c0_5] : memref<128x128xbf16, #tpu.memory_space<vmem>>, vector<128x128xbf16>
    %cst = arith.constant dense<0.000000e+00> : vector<104x128xf32>
    %6 = tpu.matmul %4, %5, %cst {dimension_numbers = #tpu.dot_dimension_numbers<[1], [0], [0], [1], [0, 0, 1, 1], [], []>} : vector<104x128xbf16>, vector<128x128xbf16>, vector<104x128xf32> -> vector<104x128xf32>
    %7 = arith.addf %3, %6 : vector<104x128xf32>
    %c0_6 = arith.constant 0 : index
    %c0_7 = arith.constant 0 : index
    %8 = vector.load %arg6[%c0_6, %c0_7] : memref<104x128xf32, #tpu.memory_space<vmem>>, vector<104x128xf32>
    tpu.vector_store %arg6[%c0_6, %c0_7], %7 {strides = array<i32>} : memref<104x128xf32, #tpu.memory_space<vmem>>, vector<104x128xf32>,
    %c0_i32_8 = arith.constant 0 : i32
    %9 = arith.cmpi eq, %arg1, %c0_i32_8 : i32
    %10 = arith.extui %9 : i1 to i32
    %c0_i32_9 = arith.constant 0 : i32
    %11 = arith.cmpi ne, %10, %c0_i32_9 : i32
    scf.if %11 {
      %c0_10 = arith.constant 0 : index
      %c0_11 = arith.constant 0 : index
      %12 = vector.load %arg6[%c0_10, %c0_11] : memref<104x128xf32, #tpu.memory_space<vmem>>, vector<104x128xf32>
      %c0_12 = arith.constant 0 : index
      %c0_13 = arith.constant 0 : index
      %13 = vector.load %arg4[%c0_12, %c0_13] : memref<104x128xf32, #tpu.memory_space<vmem>>, vector<104x128xf32>
      tpu.vector_store %arg4[%c0_12, %c0_13], %12 {strides = array<i32>} : memref<104x128xf32, #tpu.memory_space<vmem>>, vector<104x128xf32>,
      %cst_14 = arith.constant dense<0.000000e+00> : vector<128xf32>
      %14 = vector.multi_reduction <add>, %12, %cst_14 [0] : vector<104x128xf32> to vector<128xf32>
      %15 = vector.shape_cast %14 : vector<128xf32> to vector<1x128xf32>
      %16 = arith.mulf %12, %12 : vector<104x128xf32>
      %cst_15 = arith.constant dense<0.000000e+00> : vector<128xf32>
      %17 = vector.multi_reduction <add>, %16, %cst_15 [0] : vector<104x128xf32> to vector<128xf32>
      %18 = vector.shape_cast %17 : vector<128xf32> to vector<1x128xf32>
      %19 = tpu.concatenate %15, %18 in 0 : vector<1x128xf32>, vector<1x128xf32> -> vector<2x128xf32>
      %20 = vector.shape_cast %19 : vector<2x128xf32> to vector<1x2x128xf32>
      %c0_16 = arith.constant 0 : index
      %c0_17 = arith.constant 0 : index
      %c0_18 = arith.constant 0 : index
      %21 = vector.load %arg5[%c0_16, %c0_17, %c0_18] : memref<1x2x128xf32, #tpu.memory_space<vmem>>, vector<1x2x128xf32>
      tpu.vector_store %arg5[%c0_16, %c0_17, %c0_18], %20 {strides = array<i32>} : memref<1x2x128xf32, #tpu.memory_space<vmem>>, vector<1x2x128xf32>,
    } else {
    }
    return
  }
  func.func @transform_0(%arg0: i32, %arg1: i32) -> (i32, i32) {
    %c0_i32 = arith.constant 0 : i32
    return %arg0, %arg1 : i32, i32
  }
  func.func @transform_1(%arg0: i32, %arg1: i32) -> (i32, i32) {
    %c0_i32 = arith.constant 0 : i32
    %c0_i32_0 = arith.constant 0 : i32
    return %arg1, %c0_i32 : i32, i32
  }
  func.func @transform_2(%arg0: i32, %arg1: i32) -> (i32, i32) {
    %c0_i32 = arith.constant 0 : i32
    %c0_i32_0 = arith.constant 0 : i32
    return %arg0, %c0_i32 : i32, i32
  }
  func.func @transform_3(%arg0: i32, %arg1: i32) -> (i32, i32, i32) {
    %c0_i32 = arith.constant 0 : i32
    %c0_i32_0 = arith.constant 0 : i32
    %c0_i32_1 = arith.constant 0 : i32
    return %arg0, %c0_i32, %c0_i32_0 : i32, i32, i32
  }
}

module attributes {stable_mosaic.version = 11 : i64} {
  func.func @_bn_act_kernel(%arg0: i32, %arg1: memref<104x128xf32, #tpu.memory_space<vmem>>, %arg2: memref<1x128xf32, #tpu.memory_space<vmem>>, %arg3: memref<1x128xf32, #tpu.memory_space<vmem>>, %arg4: memref<104x128xbf16, #tpu.memory_space<vmem>>) attributes {dimension_semantics = [#tpu.dimension_semantics<parallel>], iteration_bounds = array<i64: 1>, scalar_prefetch = 0 : i64, scratch_operands = 0 : i64, tpu.core_type = #tpu.core_type<tc>, window_params = [{transform_indices = @transform_0, window_bounds = array<i64: 104, 128>}, {pipeline_mode = #tpu.pipeline_mode<synchronous>, transform_indices = @transform_1, window_bounds = array<i64: 1, 128>}, {pipeline_mode = #tpu.pipeline_mode<synchronous>, transform_indices = @transform_2, window_bounds = array<i64: 1, 128>}, {transform_indices = @transform_3, window_bounds = array<i64: 104, 128>}]} {
    %c0 = arith.constant 0 : index
    %c0_0 = arith.constant 0 : index
    %0 = vector.load %arg1[%c0, %c0_0] : memref<104x128xf32, #tpu.memory_space<vmem>>, vector<104x128xf32>
    %c0_1 = arith.constant 0 : index
    %c0_2 = arith.constant 0 : index
    %1 = vector.load %arg2[%c0_1, %c0_2] : memref<1x128xf32, #tpu.memory_space<vmem>>, vector<1x128xf32>
    %2 = vector.broadcast %1 : vector<1x128xf32> to vector<104x128xf32>
    %3 = arith.mulf %0, %2 : vector<104x128xf32>
    %c0_3 = arith.constant 0 : index
    %c0_4 = arith.constant 0 : index
    %4 = vector.load %arg3[%c0_3, %c0_4] : memref<1x128xf32, #tpu.memory_space<vmem>>, vector<1x128xf32>
    %5 = vector.broadcast %4 : vector<1x128xf32> to vector<104x128xf32>
    %6 = arith.addf %3, %5 : vector<104x128xf32>
    %cst = arith.constant 0.000000e+00 : f32
    %7 = vector.broadcast %cst : f32 to vector<104x128xf32>
    %8 = arith.cmpf oge, %6, %7 : vector<104x128xf32>
    %cst_5 = arith.constant 2.000000e-01 : f32
    %9 = vector.broadcast %cst_5 : f32 to vector<104x128xf32>
    %10 = arith.mulf %9, %6 : vector<104x128xf32>
    %11 = arith.select %8, %6, %10 : vector<104x128xi1>, vector<104x128xf32>
    %12 = arith.truncf %11 : vector<104x128xf32> to vector<104x128xbf16>
    %c0_6 = arith.constant 0 : index
    %c0_7 = arith.constant 0 : index
    %13 = vector.load %arg4[%c0_6, %c0_7] : memref<104x128xbf16, #tpu.memory_space<vmem>>, vector<104x128xbf16>
    tpu.vector_store %arg4[%c0_6, %c0_7], %12 {strides = array<i32>} : memref<104x128xbf16, #tpu.memory_space<vmem>>, vector<104x128xbf16>,
    return
  }
  func.func @transform_0(%arg0: i32) -> (i32, i32) {
    %c0_i32 = arith.constant 0 : i32
    %c0_i32_0 = arith.constant 0 : i32
    return %arg0, %c0_i32 : i32, i32
  }
  func.func @transform_1(%arg0: i32) -> (i32, i32) {
    %c0_i32 = arith.constant 0 : i32
    %c0_i32_0 = arith.constant 0 : i32
    %c0_i32_1 = arith.constant 0 : i32
    return %c0_i32, %c0_i32_0 : i32, i32
  }
  func.func @transform_2(%arg0: i32) -> (i32, i32) {
    %c0_i32 = arith.constant 0 : i32
    %c0_i32_0 = arith.constant 0 : i32
    %c0_i32_1 = arith.constant 0 : i32
    return %c0_i32, %c0_i32_0 : i32, i32
  }
  func.func @transform_3(%arg0: i32) -> (i32, i32) {
    %c0_i32 = arith.constant 0 : i32
    %c0_i32_0 = arith.constant 0 : i32
    return %arg0, %c0_i32 : i32, i32
  }
}

module attributes {stable_mosaic.version = 11 : i64} {
  func.func @_matmul_stats_kernel(%arg0: i32, %arg1: i32, %arg2: memref<72x256xbf16, #tpu.memory_space<vmem>>, %arg3: memref<256x128xbf16, #tpu.memory_space<vmem>>, %arg4: memref<72x128xf32, #tpu.memory_space<vmem>>, %arg5: memref<1x2x128xf32, #tpu.memory_space<vmem>>, %arg6: memref<72x128xf32, #tpu.memory_space<vmem>>) attributes {dimension_semantics = [#tpu.dimension_semantics<parallel>, #tpu.dimension_semantics<arbitrary>], iteration_bounds = array<i64: 1, 1>, scalar_prefetch = 0 : i64, scratch_operands = 1 : i64, tpu.core_type = #tpu.core_type<tc>, window_params = [{transform_indices = @transform_0, window_bounds = array<i64: 72, 256>}, {transform_indices = @transform_1, window_bounds = array<i64: 256, 128>}, {transform_indices = @transform_2, window_bounds = array<i64: 72, 128>}, {transform_indices = @transform_3, window_bounds = array<i64: 1, 2, 128>}]} {
    %c0_i32 = arith.constant 0 : i32
    %0 = arith.cmpi eq, %arg1, %c0_i32 : i32
    %1 = arith.extui %0 : i1 to i32
    %c0_i32_0 = arith.constant 0 : i32
    %2 = arith.cmpi ne, %1, %c0_i32_0 : i32
    scf.if %2 {
      %cst_10 = arith.constant 0.000000e+00 : f32
      %12 = vector.broadcast %cst_10 : f32 to vector<72x128xf32>
      %c0_11 = arith.constant 0 : index
      %c0_12 = arith.constant 0 : index
      %13 = vector.load %arg6[%c0_11, %c0_12] : memref<72x128xf32, #tpu.memory_space<vmem>>, vector<72x128xf32>
      tpu.vector_store %arg6[%c0_11, %c0_12], %12 {strides = array<i32>} : memref<72x128xf32, #tpu.memory_space<vmem>>, vector<72x128xf32>,
    } else {
    }
    %c0 = arith.constant 0 : index
    %c0_1 = arith.constant 0 : index
    %3 = vector.load %arg6[%c0, %c0_1] : memref<72x128xf32, #tpu.memory_space<vmem>>, vector<72x128xf32>
    %c0_2 = arith.constant 0 : index
    %c0_3 = arith.constant 0 : index
    %4 = vector.load %arg2[%c0_2, %c0_3] : memref<72x256xbf16, #tpu.memory_space<vmem>>, vector<72x256xbf16>
    %c0_4 = arith.constant 0 : index
    %c0_5 = arith.constant 0 : index
    %5 = vector.load %arg3[%c0_4, %c0_5] : memref<256x128xbf16, #tpu.memory_space<vmem>>, vector<256x128xbf16>
    %cst = arith.constant dense<0.000000e+00> : vector<72x128xf32>
    %6 = tpu.matmul %4, %5, %cst {dimension_numbers = #tpu.dot_dimension_numbers<[1], [0], [0], [1], [0, 0, 1, 1], [], []>} : vector<72x256xbf16>, vector<256x128xbf16>, vector<72x128xf32> -> vector<72x128xf32>
    %7 = arith.addf %3, %6 : vector<72x128xf32>
    %c0_6 = arith.constant 0 : index
    %c0_7 = arith.constant 0 : index
    %8 = vector.load %arg6[%c0_6, %c0_7] : memref<72x128xf32, #tpu.memory_space<vmem>>, vector<72x128xf32>
    tpu.vector_store %arg6[%c0_6, %c0_7], %7 {strides = array<i32>} : memref<72x128xf32, #tpu.memory_space<vmem>>, vector<72x128xf32>,
    %c0_i32_8 = arith.constant 0 : i32
    %9 = arith.cmpi eq, %arg1, %c0_i32_8 : i32
    %10 = arith.extui %9 : i1 to i32
    %c0_i32_9 = arith.constant 0 : i32
    %11 = arith.cmpi ne, %10, %c0_i32_9 : i32
    scf.if %11 {
      %c0_10 = arith.constant 0 : index
      %c0_11 = arith.constant 0 : index
      %12 = vector.load %arg6[%c0_10, %c0_11] : memref<72x128xf32, #tpu.memory_space<vmem>>, vector<72x128xf32>
      %c0_12 = arith.constant 0 : index
      %c0_13 = arith.constant 0 : index
      %13 = vector.load %arg4[%c0_12, %c0_13] : memref<72x128xf32, #tpu.memory_space<vmem>>, vector<72x128xf32>
      tpu.vector_store %arg4[%c0_12, %c0_13], %12 {strides = array<i32>} : memref<72x128xf32, #tpu.memory_space<vmem>>, vector<72x128xf32>,
      %cst_14 = arith.constant dense<0.000000e+00> : vector<128xf32>
      %14 = vector.multi_reduction <add>, %12, %cst_14 [0] : vector<72x128xf32> to vector<128xf32>
      %15 = vector.shape_cast %14 : vector<128xf32> to vector<1x128xf32>
      %16 = arith.mulf %12, %12 : vector<72x128xf32>
      %cst_15 = arith.constant dense<0.000000e+00> : vector<128xf32>
      %17 = vector.multi_reduction <add>, %16, %cst_15 [0] : vector<72x128xf32> to vector<128xf32>
      %18 = vector.shape_cast %17 : vector<128xf32> to vector<1x128xf32>
      %19 = tpu.concatenate %15, %18 in 0 : vector<1x128xf32>, vector<1x128xf32> -> vector<2x128xf32>
      %20 = vector.shape_cast %19 : vector<2x128xf32> to vector<1x2x128xf32>
      %c0_16 = arith.constant 0 : index
      %c0_17 = arith.constant 0 : index
      %c0_18 = arith.constant 0 : index
      %21 = vector.load %arg5[%c0_16, %c0_17, %c0_18] : memref<1x2x128xf32, #tpu.memory_space<vmem>>, vector<1x2x128xf32>
      tpu.vector_store %arg5[%c0_16, %c0_17, %c0_18], %20 {strides = array<i32>} : memref<1x2x128xf32, #tpu.memory_space<vmem>>, vector<1x2x128xf32>,
    } else {
    }
    return
  }
  func.func @transform_0(%arg0: i32, %arg1: i32) -> (i32, i32) {
    %c0_i32 = arith.constant 0 : i32
    return %arg0, %arg1 : i32, i32
  }
  func.func @transform_1(%arg0: i32, %arg1: i32) -> (i32, i32) {
    %c0_i32 = arith.constant 0 : i32
    %c0_i32_0 = arith.constant 0 : i32
    return %arg1, %c0_i32 : i32, i32
  }
  func.func @transform_2(%arg0: i32, %arg1: i32) -> (i32, i32) {
    %c0_i32 = arith.constant 0 : i32
    %c0_i32_0 = arith.constant 0 : i32
    return %arg0, %c0_i32 : i32, i32
  }
  func.func @transform_3(%arg0: i32, %arg1: i32) -> (i32, i32, i32) {
    %c0_i32 = arith.constant 0 : i32
    %c0_i32_0 = arith.constant 0 : i32
    %c0_i32_1 = arith.constant 0 : i32
    return %arg0, %c0_i32, %c0_i32_0 : i32, i32, i32
  }
}

module attributes {stable_mosaic.version = 11 : i64} {
  func.func @_bn_act_kernel(%arg0: i32, %arg1: memref<72x128xf32, #tpu.memory_space<vmem>>, %arg2: memref<1x128xf32, #tpu.memory_space<vmem>>, %arg3: memref<1x128xf32, #tpu.memory_space<vmem>>, %arg4: memref<72x128xbf16, #tpu.memory_space<vmem>>) attributes {dimension_semantics = [#tpu.dimension_semantics<parallel>], iteration_bounds = array<i64: 1>, scalar_prefetch = 0 : i64, scratch_operands = 0 : i64, tpu.core_type = #tpu.core_type<tc>, window_params = [{transform_indices = @transform_0, window_bounds = array<i64: 72, 128>}, {pipeline_mode = #tpu.pipeline_mode<synchronous>, transform_indices = @transform_1, window_bounds = array<i64: 1, 128>}, {pipeline_mode = #tpu.pipeline_mode<synchronous>, transform_indices = @transform_2, window_bounds = array<i64: 1, 128>}, {transform_indices = @transform_3, window_bounds = array<i64: 72, 128>}]} {
    %c0 = arith.constant 0 : index
    %c0_0 = arith.constant 0 : index
    %0 = vector.load %arg1[%c0, %c0_0] : memref<72x128xf32, #tpu.memory_space<vmem>>, vector<72x128xf32>
    %c0_1 = arith.constant 0 : index
    %c0_2 = arith.constant 0 : index
    %1 = vector.load %arg2[%c0_1, %c0_2] : memref<1x128xf32, #tpu.memory_space<vmem>>, vector<1x128xf32>
    %2 = vector.broadcast %1 : vector<1x128xf32> to vector<72x128xf32>
    %3 = arith.mulf %0, %2 : vector<72x128xf32>
    %c0_3 = arith.constant 0 : index
    %c0_4 = arith.constant 0 : index
    %4 = vector.load %arg3[%c0_3, %c0_4] : memref<1x128xf32, #tpu.memory_space<vmem>>, vector<1x128xf32>
    %5 = vector.broadcast %4 : vector<1x128xf32> to vector<72x128xf32>
    %6 = arith.addf %3, %5 : vector<72x128xf32>
    %cst = arith.constant 0.000000e+00 : f32
    %7 = vector.broadcast %cst : f32 to vector<72x128xf32>
    %8 = arith.cmpf oge, %6, %7 : vector<72x128xf32>
    %cst_5 = arith.constant 2.000000e-01 : f32
    %9 = vector.broadcast %cst_5 : f32 to vector<72x128xf32>
    %10 = arith.mulf %9, %6 : vector<72x128xf32>
    %11 = arith.select %8, %6, %10 : vector<72x128xi1>, vector<72x128xf32>
    %12 = arith.truncf %11 : vector<72x128xf32> to vector<72x128xbf16>
    %c0_6 = arith.constant 0 : index
    %c0_7 = arith.constant 0 : index
    %13 = vector.load %arg4[%c0_6, %c0_7] : memref<72x128xbf16, #tpu.memory_space<vmem>>, vector<72x128xbf16>
    tpu.vector_store %arg4[%c0_6, %c0_7], %12 {strides = array<i32>} : memref<72x128xbf16, #tpu.memory_space<vmem>>, vector<72x128xbf16>,
    return
  }
  func.func @transform_0(%arg0: i32) -> (i32, i32) {
    %c0_i32 = arith.constant 0 : i32
    %c0_i32_0 = arith.constant 0 : i32
    return %arg0, %c0_i32 : i32, i32
  }
  func.func @transform_1(%arg0: i32) -> (i32, i32) {
    %c0_i32 = arith.constant 0 : i32
    %c0_i32_0 = arith.constant 0 : i32
    %c0_i32_1 = arith.constant 0 : i32
    return %c0_i32, %c0_i32_0 : i32, i32
  }
  func.func @transform_2(%arg0: i32) -> (i32, i32) {
    %c0_i32 = arith.constant 0 : i32
    %c0_i32_0 = arith.constant 0 : i32
    %c0_i32_1 = arith.constant 0 : i32
    return %c0_i32, %c0_i32_0 : i32, i32
  }
  func.func @transform_3(%arg0: i32) -> (i32, i32) {
    %c0_i32 = arith.constant 0 : i32
    %c0_i32_0 = arith.constant 0 : i32
    return %arg0, %c0_i32 : i32, i32
  }
}

module attributes {stable_mosaic.version = 11 : i64} {
  func.func @_matmul_stats_kernel(%arg0: i32, %arg1: i32, %arg2: memref<56x512xbf16, #tpu.memory_space<vmem>>, %arg3: memref<512x128xbf16, #tpu.memory_space<vmem>>, %arg4: memref<56x128xf32, #tpu.memory_space<vmem>>, %arg5: memref<1x2x128xf32, #tpu.memory_space<vmem>>, %arg6: memref<56x128xf32, #tpu.memory_space<vmem>>) attributes {dimension_semantics = [#tpu.dimension_semantics<parallel>, #tpu.dimension_semantics<arbitrary>], iteration_bounds = array<i64: 1, 1>, scalar_prefetch = 0 : i64, scratch_operands = 1 : i64, tpu.core_type = #tpu.core_type<tc>, window_params = [{transform_indices = @transform_0, window_bounds = array<i64: 56, 512>}, {transform_indices = @transform_1, window_bounds = array<i64: 512, 128>}, {transform_indices = @transform_2, window_bounds = array<i64: 56, 128>}, {transform_indices = @transform_3, window_bounds = array<i64: 1, 2, 128>}]} {
    %c0_i32 = arith.constant 0 : i32
    %0 = arith.cmpi eq, %arg1, %c0_i32 : i32
    %1 = arith.extui %0 : i1 to i32
    %c0_i32_0 = arith.constant 0 : i32
    %2 = arith.cmpi ne, %1, %c0_i32_0 : i32
    scf.if %2 {
      %cst_10 = arith.constant 0.000000e+00 : f32
      %12 = vector.broadcast %cst_10 : f32 to vector<56x128xf32>
      %c0_11 = arith.constant 0 : index
      %c0_12 = arith.constant 0 : index
      %13 = vector.load %arg6[%c0_11, %c0_12] : memref<56x128xf32, #tpu.memory_space<vmem>>, vector<56x128xf32>
      tpu.vector_store %arg6[%c0_11, %c0_12], %12 {strides = array<i32>} : memref<56x128xf32, #tpu.memory_space<vmem>>, vector<56x128xf32>,
    } else {
    }
    %c0 = arith.constant 0 : index
    %c0_1 = arith.constant 0 : index
    %3 = vector.load %arg6[%c0, %c0_1] : memref<56x128xf32, #tpu.memory_space<vmem>>, vector<56x128xf32>
    %c0_2 = arith.constant 0 : index
    %c0_3 = arith.constant 0 : index
    %4 = vector.load %arg2[%c0_2, %c0_3] : memref<56x512xbf16, #tpu.memory_space<vmem>>, vector<56x512xbf16>
    %c0_4 = arith.constant 0 : index
    %c0_5 = arith.constant 0 : index
    %5 = vector.load %arg3[%c0_4, %c0_5] : memref<512x128xbf16, #tpu.memory_space<vmem>>, vector<512x128xbf16>
    %cst = arith.constant dense<0.000000e+00> : vector<56x128xf32>
    %6 = tpu.matmul %4, %5, %cst {dimension_numbers = #tpu.dot_dimension_numbers<[1], [0], [0], [1], [0, 0, 1, 1], [], []>} : vector<56x512xbf16>, vector<512x128xbf16>, vector<56x128xf32> -> vector<56x128xf32>
    %7 = arith.addf %3, %6 : vector<56x128xf32>
    %c0_6 = arith.constant 0 : index
    %c0_7 = arith.constant 0 : index
    %8 = vector.load %arg6[%c0_6, %c0_7] : memref<56x128xf32, #tpu.memory_space<vmem>>, vector<56x128xf32>
    tpu.vector_store %arg6[%c0_6, %c0_7], %7 {strides = array<i32>} : memref<56x128xf32, #tpu.memory_space<vmem>>, vector<56x128xf32>,
    %c0_i32_8 = arith.constant 0 : i32
    %9 = arith.cmpi eq, %arg1, %c0_i32_8 : i32
    %10 = arith.extui %9 : i1 to i32
    %c0_i32_9 = arith.constant 0 : i32
    %11 = arith.cmpi ne, %10, %c0_i32_9 : i32
    scf.if %11 {
      %c0_10 = arith.constant 0 : index
      %c0_11 = arith.constant 0 : index
      %12 = vector.load %arg6[%c0_10, %c0_11] : memref<56x128xf32, #tpu.memory_space<vmem>>, vector<56x128xf32>
      %c0_12 = arith.constant 0 : index
      %c0_13 = arith.constant 0 : index
      %13 = vector.load %arg4[%c0_12, %c0_13] : memref<56x128xf32, #tpu.memory_space<vmem>>, vector<56x128xf32>
      tpu.vector_store %arg4[%c0_12, %c0_13], %12 {strides = array<i32>} : memref<56x128xf32, #tpu.memory_space<vmem>>, vector<56x128xf32>,
      %cst_14 = arith.constant dense<0.000000e+00> : vector<128xf32>
      %14 = vector.multi_reduction <add>, %12, %cst_14 [0] : vector<56x128xf32> to vector<128xf32>
      %15 = vector.shape_cast %14 : vector<128xf32> to vector<1x128xf32>
      %16 = arith.mulf %12, %12 : vector<56x128xf32>
      %cst_15 = arith.constant dense<0.000000e+00> : vector<128xf32>
      %17 = vector.multi_reduction <add>, %16, %cst_15 [0] : vector<56x128xf32> to vector<128xf32>
      %18 = vector.shape_cast %17 : vector<128xf32> to vector<1x128xf32>
      %19 = tpu.concatenate %15, %18 in 0 : vector<1x128xf32>, vector<1x128xf32> -> vector<2x128xf32>
      %20 = vector.shape_cast %19 : vector<2x128xf32> to vector<1x2x128xf32>
      %c0_16 = arith.constant 0 : index
      %c0_17 = arith.constant 0 : index
      %c0_18 = arith.constant 0 : index
      %21 = vector.load %arg5[%c0_16, %c0_17, %c0_18] : memref<1x2x128xf32, #tpu.memory_space<vmem>>, vector<1x2x128xf32>
      tpu.vector_store %arg5[%c0_16, %c0_17, %c0_18], %20 {strides = array<i32>} : memref<1x2x128xf32, #tpu.memory_space<vmem>>, vector<1x2x128xf32>,
    } else {
    }
    return
  }
  func.func @transform_0(%arg0: i32, %arg1: i32) -> (i32, i32) {
    %c0_i32 = arith.constant 0 : i32
    return %arg0, %arg1 : i32, i32
  }
  func.func @transform_1(%arg0: i32, %arg1: i32) -> (i32, i32) {
    %c0_i32 = arith.constant 0 : i32
    %c0_i32_0 = arith.constant 0 : i32
    return %arg1, %c0_i32 : i32, i32
  }
  func.func @transform_2(%arg0: i32, %arg1: i32) -> (i32, i32) {
    %c0_i32 = arith.constant 0 : i32
    %c0_i32_0 = arith.constant 0 : i32
    return %arg0, %c0_i32 : i32, i32
  }
  func.func @transform_3(%arg0: i32, %arg1: i32) -> (i32, i32, i32) {
    %c0_i32 = arith.constant 0 : i32
    %c0_i32_0 = arith.constant 0 : i32
    %c0_i32_1 = arith.constant 0 : i32
    return %arg0, %c0_i32, %c0_i32_0 : i32, i32, i32
  }
}

module attributes {stable_mosaic.version = 11 : i64} {
  func.func @_bn_act_kernel(%arg0: i32, %arg1: memref<56x128xf32, #tpu.memory_space<vmem>>, %arg2: memref<1x128xf32, #tpu.memory_space<vmem>>, %arg3: memref<1x128xf32, #tpu.memory_space<vmem>>, %arg4: memref<56x128xbf16, #tpu.memory_space<vmem>>) attributes {dimension_semantics = [#tpu.dimension_semantics<parallel>], iteration_bounds = array<i64: 1>, scalar_prefetch = 0 : i64, scratch_operands = 0 : i64, tpu.core_type = #tpu.core_type<tc>, window_params = [{transform_indices = @transform_0, window_bounds = array<i64: 56, 128>}, {pipeline_mode = #tpu.pipeline_mode<synchronous>, transform_indices = @transform_1, window_bounds = array<i64: 1, 128>}, {pipeline_mode = #tpu.pipeline_mode<synchronous>, transform_indices = @transform_2, window_bounds = array<i64: 1, 128>}, {transform_indices = @transform_3, window_bounds = array<i64: 56, 128>}]} {
    %c0 = arith.constant 0 : index
    %c0_0 = arith.constant 0 : index
    %0 = vector.load %arg1[%c0, %c0_0] : memref<56x128xf32, #tpu.memory_space<vmem>>, vector<56x128xf32>
    %c0_1 = arith.constant 0 : index
    %c0_2 = arith.constant 0 : index
    %1 = vector.load %arg2[%c0_1, %c0_2] : memref<1x128xf32, #tpu.memory_space<vmem>>, vector<1x128xf32>
    %2 = vector.broadcast %1 : vector<1x128xf32> to vector<56x128xf32>
    %3 = arith.mulf %0, %2 : vector<56x128xf32>
    %c0_3 = arith.constant 0 : index
    %c0_4 = arith.constant 0 : index
    %4 = vector.load %arg3[%c0_3, %c0_4] : memref<1x128xf32, #tpu.memory_space<vmem>>, vector<1x128xf32>
    %5 = vector.broadcast %4 : vector<1x128xf32> to vector<56x128xf32>
    %6 = arith.addf %3, %5 : vector<56x128xf32>
    %cst = arith.constant 0.000000e+00 : f32
    %7 = vector.broadcast %cst : f32 to vector<56x128xf32>
    %8 = arith.cmpf oge, %6, %7 : vector<56x128xf32>
    %cst_5 = arith.constant 2.000000e-01 : f32
    %9 = vector.broadcast %cst_5 : f32 to vector<56x128xf32>
    %10 = arith.mulf %9, %6 : vector<56x128xf32>
    %11 = arith.select %8, %6, %10 : vector<56x128xi1>, vector<56x128xf32>
    %12 = arith.truncf %11 : vector<56x128xf32> to vector<56x128xbf16>
    %c0_6 = arith.constant 0 : index
    %c0_7 = arith.constant 0 : index
    %13 = vector.load %arg4[%c0_6, %c0_7] : memref<56x128xbf16, #tpu.memory_space<vmem>>, vector<56x128xbf16>
    tpu.vector_store %arg4[%c0_6, %c0_7], %12 {strides = array<i32>} : memref<56x128xbf16, #tpu.memory_space<vmem>>, vector<56x128xbf16>,
    return
  }
  func.func @transform_0(%arg0: i32) -> (i32, i32) {
    %c0_i32 = arith.constant 0 : i32
    %c0_i32_0 = arith.constant 0 : i32
    return %arg0, %c0_i32 : i32, i32
  }
  func.func @transform_1(%arg0: i32) -> (i32, i32) {
    %c0_i32 = arith.constant 0 : i32
    %c0_i32_0 = arith.constant 0 : i32
    %c0_i32_1 = arith.constant 0 : i32
    return %c0_i32, %c0_i32_0 : i32, i32
  }
  func.func @transform_2(%arg0: i32) -> (i32, i32) {
    %c0_i32 = arith.constant 0 : i32
    %c0_i32_0 = arith.constant 0 : i32
    %c0_i32_1 = arith.constant 0 : i32
    return %c0_i32, %c0_i32_0 : i32, i32
  }
  func.func @transform_3(%arg0: i32) -> (i32, i32) {
    %c0_i32 = arith.constant 0 : i32
    %c0_i32_0 = arith.constant 0 : i32
    return %arg0, %c0_i32 : i32, i32
  }
}

module attributes {stable_mosaic.version = 11 : i64} {
  func.func @_matmul_bias_act_kernel(%arg0: i32, %arg1: i32, %arg2: memref<32x1024xbf16, #tpu.memory_space<vmem>>, %arg3: memref<1024x128xbf16, #tpu.memory_space<vmem>>, %arg4: memref<1x128xf32, #tpu.memory_space<vmem>>, %arg5: memref<32x128xf32, #tpu.memory_space<vmem>>, %arg6: memref<32x128xf32, #tpu.memory_space<vmem>>) attributes {dimension_semantics = [#tpu.dimension_semantics<parallel>, #tpu.dimension_semantics<arbitrary>], iteration_bounds = array<i64: 1, 1>, scalar_prefetch = 0 : i64, scratch_operands = 1 : i64, tpu.core_type = #tpu.core_type<tc>, window_params = [{transform_indices = @transform_0, window_bounds = array<i64: 32, 1024>}, {transform_indices = @transform_1, window_bounds = array<i64: 1024, 128>}, {pipeline_mode = #tpu.pipeline_mode<synchronous>, transform_indices = @transform_2, window_bounds = array<i64: 1, 128>}, {transform_indices = @transform_3, window_bounds = array<i64: 32, 128>}]} {
    %c0_i32 = arith.constant 0 : i32
    %0 = arith.cmpi eq, %arg1, %c0_i32 : i32
    %1 = arith.extui %0 : i1 to i32
    %c0_i32_0 = arith.constant 0 : i32
    %2 = arith.cmpi ne, %1, %c0_i32_0 : i32
    scf.if %2 {
      %cst_10 = arith.constant 0.000000e+00 : f32
      %12 = vector.broadcast %cst_10 : f32 to vector<32x128xf32>
      %c0_11 = arith.constant 0 : index
      %c0_12 = arith.constant 0 : index
      %13 = vector.load %arg6[%c0_11, %c0_12] : memref<32x128xf32, #tpu.memory_space<vmem>>, vector<32x128xf32>
      tpu.vector_store %arg6[%c0_11, %c0_12], %12 {strides = array<i32>} : memref<32x128xf32, #tpu.memory_space<vmem>>, vector<32x128xf32>,
    } else {
    }
    %c0 = arith.constant 0 : index
    %c0_1 = arith.constant 0 : index
    %3 = vector.load %arg6[%c0, %c0_1] : memref<32x128xf32, #tpu.memory_space<vmem>>, vector<32x128xf32>
    %c0_2 = arith.constant 0 : index
    %c0_3 = arith.constant 0 : index
    %4 = vector.load %arg2[%c0_2, %c0_3] : memref<32x1024xbf16, #tpu.memory_space<vmem>>, vector<32x1024xbf16>
    %c0_4 = arith.constant 0 : index
    %c0_5 = arith.constant 0 : index
    %5 = vector.load %arg3[%c0_4, %c0_5] : memref<1024x128xbf16, #tpu.memory_space<vmem>>, vector<1024x128xbf16>
    %cst = arith.constant dense<0.000000e+00> : vector<32x128xf32>
    %6 = tpu.matmul %4, %5, %cst {dimension_numbers = #tpu.dot_dimension_numbers<[1], [0], [0], [1], [0, 0, 1, 1], [], []>} : vector<32x1024xbf16>, vector<1024x128xbf16>, vector<32x128xf32> -> vector<32x128xf32>
    %7 = arith.addf %3, %6 : vector<32x128xf32>
    %c0_6 = arith.constant 0 : index
    %c0_7 = arith.constant 0 : index
    %8 = vector.load %arg6[%c0_6, %c0_7] : memref<32x128xf32, #tpu.memory_space<vmem>>, vector<32x128xf32>
    tpu.vector_store %arg6[%c0_6, %c0_7], %7 {strides = array<i32>} : memref<32x128xf32, #tpu.memory_space<vmem>>, vector<32x128xf32>,
    %c0_i32_8 = arith.constant 0 : i32
    %9 = arith.cmpi eq, %arg1, %c0_i32_8 : i32
    %10 = arith.extui %9 : i1 to i32
    %c0_i32_9 = arith.constant 0 : i32
    %11 = arith.cmpi ne, %10, %c0_i32_9 : i32
    scf.if %11 {
      %c0_10 = arith.constant 0 : index
      %c0_11 = arith.constant 0 : index
      %12 = vector.load %arg6[%c0_10, %c0_11] : memref<32x128xf32, #tpu.memory_space<vmem>>, vector<32x128xf32>
      %c0_12 = arith.constant 0 : index
      %c0_13 = arith.constant 0 : index
      %13 = vector.load %arg4[%c0_12, %c0_13] : memref<1x128xf32, #tpu.memory_space<vmem>>, vector<1x128xf32>
      %14 = vector.broadcast %13 : vector<1x128xf32> to vector<32x128xf32>
      %15 = arith.addf %12, %14 : vector<32x128xf32>
      %c0_14 = arith.constant 0 : index
      %c0_15 = arith.constant 0 : index
      %16 = vector.load %arg5[%c0_14, %c0_15] : memref<32x128xf32, #tpu.memory_space<vmem>>, vector<32x128xf32>
      tpu.vector_store %arg5[%c0_14, %c0_15], %15 {strides = array<i32>} : memref<32x128xf32, #tpu.memory_space<vmem>>, vector<32x128xf32>,
    } else {
    }
    return
  }
  func.func @transform_0(%arg0: i32, %arg1: i32) -> (i32, i32) {
    %c0_i32 = arith.constant 0 : i32
    return %arg0, %arg1 : i32, i32
  }
  func.func @transform_1(%arg0: i32, %arg1: i32) -> (i32, i32) {
    %c0_i32 = arith.constant 0 : i32
    %c0_i32_0 = arith.constant 0 : i32
    return %arg1, %c0_i32 : i32, i32
  }
  func.func @transform_2(%arg0: i32, %arg1: i32) -> (i32, i32) {
    %c0_i32 = arith.constant 0 : i32
    %c0_i32_0 = arith.constant 0 : i32
    %c0_i32_1 = arith.constant 0 : i32
    return %c0_i32, %c0_i32_0 : i32, i32
  }
  func.func @transform_3(%arg0: i32, %arg1: i32) -> (i32, i32) {
    %c0_i32 = arith.constant 0 : i32
    %c0_i32_0 = arith.constant 0 : i32
    return %arg0, %c0_i32 : i32, i32
  }
}

</mosaic_0001>

<bundles_post_ra>
// kernel: _lambda_.8
= control target key start
LH: loop header
LB: loop body
LE: loop exit
PB: predicated region body
PF: predicated region fallthrough
CT: control target
= control target key end

     0   :  { %s647_s1 = inlined_call_operand.vmem [shape: bf16[128,128], index: 1, kind: input, shape index: {}]   ;;  %s648_s2 = inlined_call_operand.vmem [shape: f32[1,128], index: 2, kind: input, shape index: {}]   ;;  %s649_s0 = inlined_call_operand.vmem [shape: bf16[128,128], index: 0, kind: input, shape index: {}]   ;;  %s650_s3 = inlined_call_operand.vmem [shape: bf16[128,128], index: 3, kind: output, shape index: {}]  }
   0x1   :  { %v461_v0 = vld [vmem:[%s647_s1 + $0x38] sm:$0xff]  ;;  %v460_v1 = vld [vmem:[%s647_s1 + $0x30] sm:$0xff]  ;;  %v459_v2 = vld [vmem:[%s647_s1 + $0x28] sm:$0xff] }
   0x2   :  { %178 = vmatpush.bf16.msra.mxu0 %v461_v0  ;;  %509 = vmatpush.bf16.msra.mxu1 %v461_v0  ;;  %v458_v3 = vld [vmem:[%s647_s1 + $0x20] sm:$0xff]  ;;  %v457_v4 = vld [vmem:[%s647_s1 + $0x18] sm:$0xff]  ;;  %v456_v5 = vld [vmem:[%s647_s1 + $0x10] sm:$0xff] }
   0x3   :  { %510 = vmatpush.bf16.msra.mxu2 %v461_v0  ;;  %511 = vmatpush.bf16.msra.mxu3 %v461_v0  ;;  %v455_v6 = vld [vmem:[%s647_s1 + $0x8] sm:$0xff]  ;;  %v454_v7 = vld [vmem:[%s647_s1] sm:$0xff]  ;;  %v448_v9 = vld [vmem:[%s649_s0 + $0x10] sm:$0xff] }
   0x4   :  { %v446_v8 = vld [vmem:[%s649_s0] sm:$0xff]  ;;  %v452_v11 = vld [vmem:[%s649_s0 + $0x30] sm:$0xff]  ;;  %v447_v12 = vld [vmem:[%s649_s0 + $0x8] sm:$0xff] }
   0x5   :  { %v450_v10 = vld [vmem:[%s649_s0 + $0x20] sm:$0xff]  ;;  %v449_v13 = vld [vmem:[%s649_s0 + $0x18] sm:$0xff]  ;;  %v451_v14 = vld [vmem:[%s649_s0 + $0x28] sm:$0xff] }
   0x6   :  { %179 = vmatpush.bf16.msra.mxu0 %v460_v1  ;;  %512 = vmatpush.bf16.msra.mxu1 %v460_v1  ;;  %v453_v15 = vld [vmem:[%s649_s0 + $0x38] sm:$0xff]  ;;  %v605_v18 = vld [vmem:[%s648_s2] ss:$0 sm:$0xff] }
   0x7   :  { %513 = vmatpush.bf16.msra.mxu2 %v460_v1  ;;  %514 = vmatpush.bf16.msra.mxu3 %v460_v1 }
   0xa   :  { %180 = vmatpush.bf16.msra.mxu0 %v459_v2  ;;  %515 = vmatpush.bf16.msra.mxu1 %v459_v2 }
   0xb   :  { %516 = vmatpush.bf16.msra.mxu2 %v459_v2  ;;  %517 = vmatpush.bf16.msra.mxu3 %v459_v2 }
   0xe   :  { %181 = vmatpush.bf16.msra.mxu0 %v458_v3  ;;  %518 = vmatpush.bf16.msra.mxu1 %v458_v3 }
   0xf   :  { %519 = vmatpush.bf16.msra.mxu2 %v458_v3  ;;  %520 = vmatpush.bf16.msra.mxu3 %v458_v3 }
  0x12   :  { %182 = vmatpush.bf16.msra.mxu0 %v457_v4  ;;  %521 = vmatpush.bf16.msra.mxu1 %v457_v4 }
  0x13   :  { %522 = vmatpush.bf16.msra.mxu2 %v457_v4  ;;  %523 = vmatpush.bf16.msra.mxu3 %v457_v4 }
  0x16   :  { %183 = vmatpush.bf16.msra.mxu0 %v456_v5  ;;  %524 = vmatpush.bf16.msra.mxu1 %v456_v5 }
  0x17   :  { %525 = vmatpush.bf16.msra.mxu2 %v456_v5  ;;  %526 = vmatpush.bf16.msra.mxu3 %v456_v5 }
  0x1a   :  { %184 = vmatpush.bf16.msra.mxu0 %v455_v6  ;;  %527 = vmatpush.bf16.msra.mxu1 %v455_v6 }
  0x1b   :  { %528 = vmatpush.bf16.msra.mxu2 %v455_v6  ;;  %529 = vmatpush.bf16.msra.mxu3 %v455_v6 }
  0x1e   :  { %185 = vmatpush.bf16.msra.mxu0 %v454_v7  ;;  %530 = vmatpush.bf16.msra.mxu1 %v454_v7 }
  0x1f   :  { %531 = vmatpush.bf16.msra.mxu2 %v454_v7  ;;  %532 = vmatpush.bf16.msra.mxu3 %v454_v7 }
  0x21   :  { %186 = vmatmul.bf16.vlgmr.msra.gmra.mxu0 %v446_v8  ;;  %196 = vmatmul.bf16.vlgmr.msra.gmra.mxu1 %v448_v9 }
  0x22   :  { %206 = vmatmul.bf16.vlgmr.msra.gmra.mxu2 %v450_v10  ;;  %216 = vmatmul.bf16.vlgmr.msra.gmra.mxu3 %v452_v11 }
  0x31   :  { %191 = vmatmul.bf16.gmra.mxu0 %v447_v12  ;;  %201 = vmatmul.bf16.gmra.mxu1 %v449_v13 }
  0x32   :  { %211 = vmatmul.bf16.gmra.mxu2 %v451_v14  ;;  %221 = vmatmul.bf16.gmra.mxu3 %v453_v15 }
  0x9e   :  { %v187_v16 = vpop.f32.mrf.mxu0  ;;  %v197_v17 = vpop.f32.mrf.mxu1 }
  0x9f   :  { %v282_v19 = vadd.f32 %v605_v18, %v187_v16  ;;  %v286_v20 = vadd.f32 %v605_v18, %v197_v17 }
  0xa1   :  { %v314_v25 = vmul.f32 0.2, %v282_v19  ;;  %v318_v26 = vmul.f32 0.2, %v286_v20  ;;  %vm298_vm0 = vcmp.ge.f32.partialorder %v282_v19, 0.0  ;;  %vm302_vm1 = vcmp.ge.f32.partialorder %v286_v20, 0.0 }
  0xa3   :  { %v330_v33 = vsel %vm298_vm0, %v282_v19, %v314_v25  ;;  %v334_v34 = vsel %vm302_vm1, %v286_v20, %v318_v26 }
  0xa5   :  { %v207_v21 = vpop.f32.mrf.mxu2  ;;  %v217_v22 = vpop.f32.mrf.mxu3 }
  0xa6   :  { %v189_v23 = vpop.f32.mrf.mxu0  ;;  %v199_v24 = vpop.f32.mrf.mxu1  ;;  %v290_v31 = vadd.f32 %v605_v18, %v207_v21  ;;  %v294_v32 = vadd.f32 %v605_v18, %v217_v22 }
  0xa7   :  { %v283_v27 = vadd.f32 %v605_v18, %v189_v23  ;;  %v287_v28 = vadd.f32 %v605_v18, %v199_v24 }
  0xa8   :  { %v322_v41 = vmul.f32 0.2, %v290_v31  ;;  %v326_v42 = vmul.f32 0.2, %v294_v32  ;;  %vm306_vm4 = vcmp.ge.f32.partialorder %v290_v31, 0.0  ;;  %vm310_vm5 = vcmp.ge.f32.partialorder %v294_v32, 0.0 }
  0xa9   :  { %vm299_vm2 = vcmp.ge.f32.partialorder %v283_v27, 0.0  ;;  %v315_v29 = vmul.f32 0.2, %v283_v27  ;;  %vm303_vm3 = vcmp.ge.f32.partialorder %v287_v28, 0.0  ;;  %v319_v30 = vmul.f32 0.2, %v287_v28 }
  0xaa   :  { %v338_v49 = vsel %vm306_vm4, %v290_v31, %v322_v41  ;;  %v342_v50 = vsel %vm310_vm5, %v294_v32, %v326_v42 }
  0xab   :  { %v331_v35 = vsel %vm299_vm2, %v283_v27, %v315_v29  ;;  %v335_v36 = vsel %vm303_vm3, %v287_v28, %v319_v30 }
  0xac   :  { %v465_v37 = vpack.c.bf16 %v331_v35, %v330_v33  ;;  %v475_v38 = vpack.c.bf16 %v335_v36, %v334_v34 }
  0xad   :  { %v209_v39 = vpop.f32.mrf.mxu2  ;;  %v219_v40 = vpop.f32.mrf.mxu3 }
  0xae   :  { %466 = vst [vmem:[%s650_s3] sm:$0xff] %v465_v37   ;;  %v291_v43 = vadd.f32 %v605_v18, %v209_v39  ;;  %v295_v44 = vadd.f32 %v605_v18, %v219_v40  ;;  %v192_v45 = vpop.f32.mrf.mxu0  ;;  %v202_v46 = vpop.f32.mrf.mxu1 }
  0xaf   :  { %503 = vst [vmem:[%s650_s3 + $0x10] sm:$0xff] %v475_v38   ;;  %v284_v55 = vadd.f32 %v605_v18, %v192_v45  ;;  %v288_v56 = vadd.f32 %v605_v18, %v202_v46 }
  0xb0   :  { %vm307_vm6 = vcmp.ge.f32.partialorder %v291_v43, 0.0  ;;  %v323_v47 = vmul.f32 0.2, %v291_v43  ;;  %vm311_vm7 = vcmp.ge.f32.partialorder %v295_v44, 0.0  ;;  %v327_v48 = vmul.f32 0.2, %v295_v44 }
  0xb1   :  { %v316_v61 = vmul.f32 0.2, %v284_v55  ;;  %v320_v62 = vmul.f32 0.2, %v288_v56  ;;  %vm300_vm8 = vcmp.ge.f32.partialorder %v284_v55, 0.0  ;;  %vm304_vm9 = vcmp.ge.f32.partialorder %v288_v56, 0.0 }
  0xb2   :  { %v339_v51 = vsel %vm307_vm6, %v291_v43, %v323_v47  ;;  %v343_v52 = vsel %vm311_vm7, %v295_v44, %v327_v48 }
  0xb3   :  { %v485_v53 = vpack.c.bf16 %v339_v51, %v338_v49  ;;  %v495_v54 = vpack.c.bf16 %v343_v52, %v342_v50  ;;  %v332_v5 = vsel %vm300_vm8, %v284_v55, %v316_v61  ;;  %v336_v6 = vsel %vm304_vm9, %v288_v56, %v320_v62 }
  0xb5   :  { %505 = vst [vmem:[%s650_s3 + $0x20] sm:$0xff] %v485_v53   ;;  %v212_v57 = vpop.f32.mrf.mxu2  ;;  %v222_v58 = vpop.f32.mrf.mxu3 }
  0xb6   :  { %507 = vst [vmem:[%s650_s3 + $0x30] sm:$0xff] %v495_v54   ;;  %v194_v59 = vpop.f32.mrf.mxu0  ;;  %v204_v60 = vpop.f32.mrf.mxu1  ;;  %v292_v3 = vadd.f32 %v605_v18, %v212_v57  ;;  %v296_v4 = vadd.f32 %v605_v18, %v222_v58 }
  0xb7   :  { %v285_v63 = vadd.f32 %v605_v18, %v194_v59  ;;  %v289_v0 = vadd.f32 %v605_v18, %v204_v60 }
  0xb8   :  { %v324_v13 = vmul.f32 0.2, %v292_v3  ;;  %v328_v14 = vmul.f32 0.2, %v296_v4  ;;  %vm308_vm12 = vcmp.ge.f32.partialorder %v292_v3, 0.0  ;;  %vm312_vm13 = vcmp.ge.f32.partialorder %v296_v4, 0.0 }
  0xb9   :  { %vm301_vm10 = vcmp.ge.f32.partialorder %v285_v63, 0.0  ;;  %v317_v1 = vmul.f32 0.2, %v285_v63  ;;  %vm305_vm11 = vcmp.ge.f32.partialorder %v289_v0, 0.0  ;;  %v321_v2 = vmul.f32 0.2, %v289_v0 }
  0xba   :  { %v340_v20 = vsel %vm308_vm12, %v292_v3, %v324_v13  ;;  %v344_v21 = vsel %vm312_vm13, %v296_v4, %v328_v14 }
  0xbb   :  { %v333_v7 = vsel %vm301_vm10, %v285_v63, %v317_v1  ;;  %v337_v8 = vsel %vm305_vm11, %v289_v0, %v321_v2 }
  0xbc   :  { %v470_v9 = vpack.c.bf16 %v333_v7, %v332_v5  ;;  %v480_v10 = vpack.c.bf16 %v337_v8, %v336_v6 }
  0xbd   :  { %v214_v11 = vpop.f32.mrf.mxu2  ;;  %v224_v12 = vpop.f32.mrf.mxu3 }
  0xbe   :  { %502 = vst [vmem:[%s650_s3 + $0x8] sm:$0xff] %v470_v9   ;;  %v293_v15 = vadd.f32 %v605_v18, %v214_v11  ;;  %v297_v16 = vadd.f32 %v605_v18, %v224_v12 }
  0xbf   :  { %504 = vst [vmem:[%s650_s3 + $0x18] sm:$0xff] %v480_v10  }
  0xc0   :  { %vm309_vm14 = vcmp.ge.f32.partialorder %v293_v15, 0.0  ;;  %v325_v17 = vmul.f32 0.2, %v293_v15  ;;  %vm313_vm15 = vcmp.ge.f32.partialorder %v297_v16, 0.0  ;;  %v329_v19 = vmul.f32 0.2, %v297_v16 }
  0xc2   :  { %v341_v22 = vsel %vm309_vm14, %v293_v15, %v325_v17  ;;  %v345_v23 = vsel %vm313_vm15, %v297_v16, %v329_v19 }
  0xc3   :  { %v490_v24 = vpack.c.bf16 %v341_v22, %v340_v20  ;;  %v500_v25 = vpack.c.bf16 %v345_v23, %v344_v21 }
  0xc5   :  { %506 = vst [vmem:[%s650_s3 + $0x28] sm:$0xff] %v490_v24  }
  0xc6   :  { %508 = vst [vmem:[%s650_s3 + $0x38] sm:$0xff] %v500_v25  }

// kernel: _lambda_.10
= control target key start
LH: loop header
LB: loop body
LE: loop exit
PB: predicated region body
PF: predicated region fallthrough
CT: control target
= control target key end

     0   :  { %s284_s0 = inlined_call_operand.vmem [shape: f32[104,128], index: 0, kind: input, shape index: {}]   ;;  %s285_s1 = inlined_call_operand.vmem [shape: f32[1,128], index: 1, kind: input, shape index: {}]   ;;  %s286_s2 = inlined_call_operand.vmem [shape: f32[1,128], index: 2, kind: input, shape index: {}]   ;;  %s287_s3 = inlined_call_operand.vmem [shape: bf16[104,128], index: 3, kind: output, shape index: {}]  }
   0x1   :  { %v14_v0 = vld [vmem:[%s284_s0] sm:$0xff]  ;;  %v15_v1 = vld [vmem:[%s284_s0 + $0x8] sm:$0xff]  ;;  %v16_v4 = vld [vmem:[%s284_s0 + $0x10] sm:$0xff] }
   0x2   :  { %v196_v2 = vld [vmem:[%s285_s1] ss:$0 sm:$0xff]  ;;  %v17_v5 = vld [vmem:[%s284_s0 + $0x18] sm:$0xff]  ;;  %v19_v11 = vld [vmem:[%s284_s0 + $0x28] sm:$0xff] }
   0x3   :  { %v201_v3 = vld [vmem:[%s286_s2] ss:$0 sm:$0xff]  ;;  %v31_v7 = vmul.f32 %v196_v2, %v14_v0  ;;  %v32_v8 = vmul.f32 %v196_v2, %v15_v1  ;;  %v33_v9 = vmul.f32 %v196_v2, %v16_v4  ;;  %v34_v10 = vmul.f32 %v196_v2, %v17_v5  ;;  %v20_v12 = vld [vmem:[%s284_s0 + $0x30] sm:$0xff]  ;;  %v21_v13 = vld [vmem:[%s284_s0 + $0x38] sm:$0xff] }
   0x4   :  { %v18_v6 = vld [vmem:[%s284_s0 + $0x20] sm:$0xff]  ;;  %v36_v15 = vmul.f32 %v196_v2, %v19_v11  ;;  %v37_v16 = vmul.f32 %v196_v2, %v20_v12  ;;  %v38_v17 = vmul.f32 %v196_v2, %v21_v13  ;;  %v23_v37 = vld [vmem:[%s284_s0 + $0x48] sm:$0xff]  ;;  %v24_v38 = vld [vmem:[%s284_s0 + $0x50] sm:$0xff] }
   0x5   :  { %v35_v14 = vmul.f32 %v196_v2, %v18_v6  ;;  %v48_v18 = vadd.f32 %v201_v3, %v31_v7  ;;  %v49_v19 = vadd.f32 %v201_v3, %v32_v8  ;;  %v50_v20 = vadd.f32 %v201_v3, %v33_v9  ;;  %v22_v32 = vld [vmem:[%s284_s0 + $0x40] sm:$0xff]  ;;  %v25_v39 = vld [vmem:[%s284_s0 + $0x58] sm:$0xff] }
   0x6   :  { %v51_v21 = vadd.f32 %v201_v3, %v34_v10  ;;  %v53_v23 = vadd.f32 %v201_v3, %v36_v15  ;;  %v54_v24 = vadd.f32 %v201_v3, %v37_v16  ;;  %v55_v25 = vadd.f32 %v201_v3, %v38_v17  ;;  %v26_v50 = vld [vmem:[%s284_s0 + $0x60] sm:$0xff] }
   0x7   :  { %v52_v22 = vadd.f32 %v201_v3, %v35_v14  ;;  %vm61_vm0 = vcmp.ge.f32.partialorder %v48_v18, 0.0  ;;  %vm62_vm1 = vcmp.ge.f32.partialorder %v49_v19, 0.0  ;;  %v74_v26 = vmul.f32 0.2, %v48_v18 }
   0x8   :  { %v75_v27 = vmul.f32 0.2, %v49_v19  ;;  %vm63_vm2 = vcmp.ge.f32.partialorder %v50_v20, 0.0  ;;  %vm64_vm3 = vcmp.ge.f32.partialorder %v51_v21, 0.0  ;;  %v76_v28 = vmul.f32 0.2, %v50_v20 }
   0x9   :  { %v77_v29 = vmul.f32 0.2, %v51_v21  ;;  %v87_v30 = vsel %vm61_vm0, %v48_v18, %v74_v26  ;;  %vm65_vm4 = vcmp.ge.f32.partialorder %v52_v22, 0.0  ;;  %vm66_vm5 = vcmp.ge.f32.partialorder %v53_v23, 0.0 }
   0xa   :  { %v88_v31 = vsel %vm62_vm1, %v49_v19, %v75_v27  ;;  %v89_v34 = vsel %vm63_vm2, %v50_v20, %v76_v28  ;;  %v78_v36 = vmul.f32 0.2, %v52_v22  ;;  %v79_v41 = vmul.f32 0.2, %v53_v23 }
   0xb   :  { %v133_v33 = vpack.c.bf16 %v88_v31, %v87_v30  ;;  %v90_v35 = vsel %vm64_vm3, %v51_v21, %v77_v29  ;;  %vm67_vm6 = vcmp.ge.f32.partialorder %v54_v24, 0.0  ;;  %vm68_vm7 = vcmp.ge.f32.partialorder %v55_v25, 0.0 }
   0xc   :  { %v138_v40 = vpack.c.bf16 %v90_v35, %v89_v34  ;;  %v91_v42 = vsel %vm65_vm4, %v52_v22, %v78_v36  ;;  %v80_v43 = vmul.f32 0.2, %v54_v24  ;;  %v81_v44 = vmul.f32 0.2, %v55_v25 }
   0xd   :  { %134 = vst [vmem:[%s287_s3] sm:$0xff] %v133_v33   ;;  %v39_v45 = vmul.f32 %v196_v2, %v22_v32  ;;  %v92_v46 = vsel %vm66_vm5, %v53_v23, %v79_v41  ;;  %v40_v47 = vmul.f32 %v196_v2, %v23_v37  ;;  %v41_v48 = vmul.f32 %v196_v2, %v24_v38 }
   0xe   :  { %160 = vst [vmem:[%s287_s3 + $0x8] sm:$0xff] %v138_v40   ;;  %v42_v49 = vmul.f32 %v196_v2, %v25_v39  ;;  %v143_v51 = vpack.c.bf16 %v92_v46, %v91_v42  ;;  %v93_v52 = vsel %vm67_vm6, %v54_v24, %v80_v43  ;;  %v94_v53 = vsel %vm68_vm7, %v55_v25, %v81_v44 }
   0xf   :  { %v56_v54 = vadd.f32 %v201_v3, %v39_v45  ;;  %v148_v55 = vpack.c.bf16 %v94_v53, %v93_v52  ;;  %v57_v56 = vadd.f32 %v201_v3, %v40_v47  ;;  %v58_v57 = vadd.f32 %v201_v3, %v41_v48 }
  0x10   :  { %v59_v58 = vadd.f32 %v201_v3, %v42_v49  ;;  %161 = vst [vmem:[%s287_s3 + $0x10] sm:$0xff] %v143_v51   ;;  %v43_v60 = vmul.f32 %v196_v2, %v26_v50 }
  0x11   :  { %vm69_vm8 = vcmp.ge.f32.partialorder %v56_v54, 0.0  ;;  %v82_v59 = vmul.f32 0.2, %v56_v54  ;;  %162 = vst [vmem:[%s287_s3 + $0x18] sm:$0xff] %v148_v55   ;;  %vm70_vm9 = vcmp.ge.f32.partialorder %v57_v56, 0.0  ;;  %vm71_vm10 = vcmp.ge.f32.partialorder %v58_v57, 0.0 }
  0x12   :  { %v83_v61 = vmul.f32 0.2, %v57_v56  ;;  %vm72_vm11 = vcmp.ge.f32.partialorder %v59_v58, 0.0  ;;  %v84_v63 = vmul.f32 0.2, %v58_v57  ;;  %v60_v1 = vadd.f32 %v201_v3, %v43_v60 }
  0x13   :  { %v95_v62 = vsel %vm69_vm8, %v56_v54, %v82_v59  ;;  %v85_v0 = vmul.f32 0.2, %v59_v58 }
  0x14   :  { %v96_v4 = vsel %vm70_vm9, %v57_v56, %v83_v61  ;;  %v97_v6 = vsel %vm71_vm10, %v58_v57, %v84_v63  ;;  %vm73_vm12 = vcmp.ge.f32.partialorder %v60_v1, 0.0  ;;  %v86_v2 = vmul.f32 0.2, %v60_v1 }
  0x15   :  { %v153_v5 = vpack.c.bf16 %v96_v4, %v95_v62  ;;  %v98_v7 = vsel %vm72_vm11, %v59_v58, %v85_v0 }
  0x16   :  { %v158_v8 = vpack.c.bf16 %v98_v7, %v97_v6  ;;  %v99_v9 = vsel %vm73_vm12, %v60_v1, %v86_v2 }
  0x17   :  { %163 = vst [vmem:[%s287_s3 + $0x20] sm:$0xff] %v153_v5   ;;  %v112_v10 = vpack.c.bf16 %v99_v9, %v99_v9 }
  0x18   :  { %164 = vst [vmem:[%s287_s3 + $0x28] sm:$0xff] %v158_v8  }
  0x19   :  { %125 = vst [vmem:[%s287_s3 + $0x30] sm:$0xf] %v112_v10 }

// kernel: _lambda_.9
= control target key start
LH: loop header
LB: loop body
LE: loop exit
PB: predicated region body
PF: predicated region fallthrough
CT: control target
= control target key end

     0   :  { %vm307_vm0 = vcmask 1040384   ;;  %s519_s1 = inlined_call_operand.vmem [shape: bf16[128,128], index: 1, kind: input, shape index: {}]   ;;  %s520_s0 = inlined_call_operand.vmem [shape: bf16[104,128], index: 0, kind: input, shape index: {}]   ;;  %s521_s2 = inlined_call_operand.vmem [shape: f32[104,128], index: 2, kind: output, shape index: {0}]   ;;  %s522_s3 = inlined_call_operand.vmem [shape: f32[1,2,128], index: 3, kind: output, shape index: {1}]  }
   0x1   :  { %v387_v0 = vld [vmem:[%s519_s1 + $0x38] sm:$0xff]  ;;  %v386_v1 = vld [vmem:[%s519_s1 + $0x30] sm:$0xff]  ;;  %v385_v2 = vld [vmem:[%s519_s1 + $0x28] sm:$0xff] }
   0x2   :  { %160 = vmatpush.bf16.msra.mxu0 %v387_v0  ;;  %388 = vmatpush.bf16.msra.mxu1 %v387_v0  ;;  %v384_v3 = vld [vmem:[%s519_s1 + $0x20] sm:$0xff]  ;;  %v383_v4 = vld [vmem:[%s519_s1 + $0x18] sm:$0xff]  ;;  %v382_v5 = vld [vmem:[%s519_s1 + $0x10] sm:$0xff] }
   0x3   :  { %389 = vmatpush.bf16.msra.mxu2 %v387_v0  ;;  %390 = vmatpush.bf16.msra.mxu3 %v387_v0  ;;  %v381_v6 = vld [vmem:[%s519_s1 + $0x8] sm:$0xff]  ;;  %v380_v7 = vld [vmem:[%s519_s1] sm:$0xff]  ;;  %v377_v10 = vld [vmem:[%s520_s0 + $0x18] sm:$0xff] }
   0x4   :  { %v374_v8 = vld [vmem:[%s520_s0] sm:$0xff]  ;;  %v375_v9 = vld [vmem:[%s520_s0 + $0x8] sm:$0xff]  ;;  %v55_v12 = vld [vmem:[%s520_s0 + $0x30] sm:$0xf] }
   0x5   :  { %v379_v11 = vld [vmem:[%s520_s0 + $0x28] sm:$0xff]  ;;  %v97_v13 = vunpack.c.l.b16 %v55_v12  ;;  %v376_v14 = vld [vmem:[%s520_s0 + $0x10] sm:$0xff]  ;;  %v378_v15 = vld [vmem:[%s520_s0 + $0x20] sm:$0xff] }
   0x6   :  { %161 = vmatpush.bf16.msra.mxu0 %v386_v1  ;;  %391 = vmatpush.bf16.msra.mxu1 %v386_v1 }
   0x7   :  { %392 = vmatpush.bf16.msra.mxu2 %v386_v1  ;;  %393 = vmatpush.bf16.msra.mxu3 %v386_v1  ;;  %v104_v16 = vpack.c.b16 %v97_v13, %v97_v13 }
   0xa   :  { %162 = vmatpush.bf16.msra.mxu0 %v385_v2  ;;  %394 = vmatpush.bf16.msra.mxu1 %v385_v2 }
   0xb   :  { %395 = vmatpush.bf16.msra.mxu2 %v385_v2  ;;  %396 = vmatpush.bf16.msra.mxu3 %v385_v2 }
   0xe   :  { %163 = vmatpush.bf16.msra.mxu0 %v384_v3  ;;  %397 = vmatpush.bf16.msra.mxu1 %v384_v3 }
   0xf   :  { %398 = vmatpush.bf16.msra.mxu2 %v384_v3  ;;  %399 = vmatpush.bf16.msra.mxu3 %v384_v3 }
  0x12   :  { %164 = vmatpush.bf16.msra.mxu0 %v383_v4  ;;  %400 = vmatpush.bf16.msra.mxu1 %v383_v4 }
  0x13   :  { %401 = vmatpush.bf16.msra.mxu2 %v383_v4  ;;  %402 = vmatpush.bf16.msra.mxu3 %v383_v4 }
  0x16   :  { %165 = vmatpush.bf16.msra.mxu0 %v382_v5  ;;  %403 = vmatpush.bf16.msra.mxu1 %v382_v5 }
  0x17   :  { %404 = vmatpush.bf16.msra.mxu2 %v382_v5  ;;  %405 = vmatpush.bf16.msra.mxu3 %v382_v5 }
  0x1a   :  { %166 = vmatpush.bf16.msra.mxu0 %v381_v6  ;;  %406 = vmatpush.bf16.msra.mxu1 %v381_v6 }
  0x1b   :  { %407 = vmatpush.bf16.msra.mxu2 %v381_v6  ;;  %408 = vmatpush.bf16.msra.mxu3 %v381_v6 }
  0x1e   :  { %167 = vmatpush.bf16.msra.mxu0 %v380_v7  ;;  %409 = vmatpush.bf16.msra.mxu1 %v380_v7 }
  0x1f   :  { %410 = vmatpush.bf16.msra.mxu2 %v380_v7  ;;  %411 = vmatpush.bf16.msra.mxu3 %v380_v7 }
  0x21   :  { %168 = vmatmul.bf16.vlgmr.msra.gmra.mxu0 %v374_v8  ;;  %173 = vmatmul.bf16.vlgmr.msra.gmra.mxu1 %v375_v9 }
  0x22   :  { %183 = vmatmul.bf16.vlgmr.msra.gmra.mxu2 %v377_v10  ;;  %193 = vmatmul.bf16.vlgmr.msra.gmra.mxu3 %v379_v11 }
  0x31   :  { %178 = vmatmul.bf16.gmra.mxu1 %v376_v14 }
  0x32   :  { %188 = vmatmul.bf16.gmra.mxu2 %v378_v15  ;;  %198 = vmatmul.bf16.gmra.mxu3 %v104_v16 }
  0x9e   :  { %v169_v17 = vpop.f32.mrf.mxu0  ;;  %v174_v18 = vpop.f32.mrf.mxu1 }
  0x9f   :  { %245 = vst [vmem:[%s521_s2] sm:$0xff] %v169_v17  ;;  %v276_v23 = vmul.f32 %v169_v17, %v169_v17  ;;  %v278_v30 = vmul.f32 %v174_v18, %v174_v18 }
  0xa0   :  { %247 = vst [vmem:[%s521_s2 + $0x10] sm:$0xff] %v174_v18 }
  0xa5   :  { %v184_v19 = vpop.f32.mrf.mxu2  ;;  %v194_v20 = vpop.f32.mrf.mxu3 }
  0xa6   :  { %251 = vst [vmem:[%s521_s2 + $0x30] sm:$0xff] %v184_v19  ;;  %v171_v21 = vpop.f32.mrf.mxu0  ;;  %v176_v22 = vpop.f32.mrf.mxu1  ;;  %v282_v44 = vmul.f32 %v184_v19, %v184_v19  ;;  %v286_v58 = vmul.f32 %v194_v20, %v194_v20 }
  0xa7   :  { %246 = vst [vmem:[%s521_s2 + $0x8] sm:$0xff] %v171_v21  ;;  %v277_v24 = vmul.f32 %v171_v21, %v171_v21  ;;  %v258_v25 = vadd.f32 %v171_v21, %v169_v17  ;;  %v279_v34 = vmul.f32 %v176_v22, %v176_v22 }
  0xa8   :  { %248 = vst [vmem:[%s521_s2 + $0x18] sm:$0xff] %v176_v22 }
  0xa9   :  { %255 = vst [vmem:[%s521_s2 + $0x50] sm:$0xff] %v194_v20  ;;  %v289_v26 = vadd.f32 %v277_v24, %v276_v23  ;;  %v259_v31 = vadd.f32 %v258_v25, %v174_v18 }
  0xab   :  { %v290_v32 = vadd.f32 %v289_v26, %v278_v30  ;;  %v260_v33 = vadd.f32 %v259_v31, %v176_v22 }
  0xad   :  { %v186_v27 = vpop.f32.mrf.mxu2  ;;  %v196_v28 = vpop.f32.mrf.mxu3  ;;  %v291_v36 = vadd.f32 %v290_v32, %v279_v34 }
  0xae   :  { %252 = vst [vmem:[%s521_s2 + $0x38] sm:$0xff] %v186_v27  ;;  %v179_v29 = vpop.f32.mrf.mxu1  ;;  %v283_v47 = vmul.f32 %v186_v27, %v186_v27  ;;  %v287_v61 = vmul.f32 %v196_v28, %v196_v28 }
  0xaf   :  { %249 = vst [vmem:[%s521_s2 + $0x20] sm:$0xff] %v179_v29  ;;  %v280_v35 = vmul.f32 %v179_v29, %v179_v29  ;;  %v261_v37 = vadd.f32 %v260_v33, %v179_v29 }
  0xb0   :  { %256 = vst [vmem:[%s521_s2 + $0x58] sm:$0xff] %v196_v28 }
  0xb1   :  { %v292_v41 = vadd.f32 %v291_v36, %v280_v35 }
  0xb5   :  { %v189_v38 = vpop.f32.mrf.mxu2  ;;  %v199_v39 = vpop.f32.mrf.mxu3 }
  0xb6   :  { %253 = vst [vmem:[%s521_s2 + $0x40] sm:$0xff] %v189_v38  ;;  %v181_v40 = vpop.f32.mrf.mxu1  ;;  %v284_v50 = vmul.f32 %v189_v38, %v189_v38  ;;  %v288_v0 = vmul.f32 %v199_v39, %v199_v39 }
  0xb7   :  { %250 = vst [vmem:[%s521_s2 + $0x28] sm:$0xff] %v181_v40  ;;  %v262_v42 = vadd.f32 %v261_v37, %v181_v40  ;;  %v281_v43 = vmul.f32 %v181_v40, %v181_v40 }
  0xb8   :  { %257 = vst [vmem:[%s521_s2 + $0x60] sm:$0xff] %v199_v39 }
  0xb9   :  { %v263_v45 = vadd.f32 %v262_v42, %v184_v19  ;;  %v293_v46 = vadd.f32 %v292_v41, %v281_v43 }
  0xbb   :  { %v294_v48 = vadd.f32 %v293_v46, %v282_v44  ;;  %v264_v49 = vadd.f32 %v263_v45, %v186_v27 }
  0xbd   :  { %v191_v51 = vpop.f32.mrf.mxu2  ;;  %v265_v52 = vadd.f32 %v264_v49, %v189_v38  ;;  %v295_v53 = vadd.f32 %v294_v48, %v283_v47  ;;  %v201_v54 = vpop.f32.mrf.mxu3 }
  0xbe   :  { %254 = vst [vmem:[%s521_s2 + $0x48] sm:$0xff] %v191_v51  ;;  %v285_v56 = vmul.f32 %v191_v51, %v191_v51 }
  0xbf   :  { %v266_v55 = vadd.f32 %v265_v52, %v191_v51  ;;  %v296_v57 = vadd.f32 %v295_v53, %v284_v50 }
  0xc1   :  { %v267_v59 = vadd.f32 %v266_v55, %v194_v20  ;;  %v297_v60 = vadd.f32 %v296_v57, %v285_v56 }
  0xc3   :  { %v298_v62 = vadd.f32 %v297_v60, %v286_v58  ;;  %v268_v63 = vadd.f32 %v267_v59, %v196_v28 }
  0xc5   :  { %v269_v1 = vadd.f32 %v268_v63, %v199_v39  ;;  %v299_v2 = vadd.f32 %v298_v62, %v287_v61 }
  0xc7   :  { %v270_v3 = vrot.slane %v269_v1, 4  ;;  %v300_v4 = vadd.f32 %v299_v2, %v288_v0 }
  0xc9   :  { %v271_v5 = vadd.f32 %v270_v3, %v269_v1  ;;  %v301_v6 = vrot.slane %v300_v4, 4 }
  0xcb   :  { %v272_v7 = vrot.slane %v271_v5, 2  ;;  %v302_v8 = vadd.f32 %v301_v6, %v300_v4 }
  0xcd   :  { %v273_v9 = vadd.f32 %v272_v7, %v271_v5  ;;  %v303_v10 = vrot.slane %v302_v8, 2 }
  0xcf   :  { %v274_v11 = vrot.slane %v273_v9, 1  ;;  %v304_v12 = vadd.f32 %v303_v10, %v302_v8 }
  0xd1   :  { %v305_v13 = vrot.slane %v304_v12, 1  ;;  %v275_v14 = vadd.f32 %v274_v11, %v273_v9 }
  0xd3   :  { %v306_v15 = vadd.f32 %v305_v13, %v304_v12 }
  0xd5   :  { %v308_v16 = vsel %vm307_vm0, %v275_v14, %v306_v15 }
  0xd6   :  { %309 = vst [vmem:[%s522_s3] sm:$0x3] %v308_v16 }

// kernel: _lambda_.12
= control target key start
LH: loop header
LB: loop body
LE: loop exit
PB: predicated region body
PF: predicated region fallthrough
CT: control target
= control target key end

     0   :  { %s192_s0 = inlined_call_operand.vmem [shape: f32[72,128], index: 0, kind: input, shape index: {}]   ;;  %s193_s1 = inlined_call_operand.vmem [shape: f32[1,128], index: 1, kind: input, shape index: {}]   ;;  %s194_s2 = inlined_call_operand.vmem [shape: f32[1,128], index: 2, kind: input, shape index: {}]   ;;  %s195_s3 = inlined_call_operand.vmem [shape: bf16[72,128], index: 3, kind: output, shape index: {}]  }
   0x1   :  { %v14_v0 = vld [vmem:[%s192_s0] sm:$0xff]  ;;  %v15_v1 = vld [vmem:[%s192_s0 + $0x8] sm:$0xff]  ;;  %v16_v4 = vld [vmem:[%s192_s0 + $0x10] sm:$0xff] }
   0x2   :  { %v121_v2 = vld [vmem:[%s193_s1] ss:$0 sm:$0xff]  ;;  %v17_v5 = vld [vmem:[%s192_s0 + $0x18] sm:$0xff]  ;;  %v19_v11 = vld [vmem:[%s192_s0 + $0x28] sm:$0xff] }
   0x3   :  { %v122_v3 = vld [vmem:[%s194_s2] ss:$0 sm:$0xff]  ;;  %v27_v7 = vmul.f32 %v121_v2, %v14_v0  ;;  %v28_v8 = vmul.f32 %v121_v2, %v15_v1  ;;  %v29_v9 = vmul.f32 %v121_v2, %v16_v4  ;;  %v30_v10 = vmul.f32 %v121_v2, %v17_v5  ;;  %v20_v12 = vld [vmem:[%s192_s0 + $0x30] sm:$0xff]  ;;  %v21_v13 = vld [vmem:[%s192_s0 + $0x38] sm:$0xff] }
   0x4   :  { %v18_v6 = vld [vmem:[%s192_s0 + $0x20] sm:$0xff]  ;;  %v32_v15 = vmul.f32 %v121_v2, %v19_v11  ;;  %v33_v16 = vmul.f32 %v121_v2, %v20_v12  ;;  %v34_v17 = vmul.f32 %v121_v2, %v21_v13 }
   0x5   :  { %v31_v14 = vmul.f32 %v121_v2, %v18_v6  ;;  %v40_v18 = vadd.f32 %v122_v3, %v27_v7  ;;  %v41_v19 = vadd.f32 %v122_v3, %v28_v8  ;;  %v42_v20 = vadd.f32 %v122_v3, %v29_v9  ;;  %v22_v32 = vld [vmem:[%s192_s0 + $0x40] sm:$0xff] }
   0x6   :  { %v43_v21 = vadd.f32 %v122_v3, %v30_v10  ;;  %v45_v23 = vadd.f32 %v122_v3, %v32_v15  ;;  %v46_v24 = vadd.f32 %v122_v3, %v33_v16  ;;  %v47_v25 = vadd.f32 %v122_v3, %v34_v17 }
   0x7   :  { %v44_v22 = vadd.f32 %v122_v3, %v31_v14  ;;  %vm49_vm0 = vcmp.ge.f32.partialorder %v40_v18, 0.0  ;;  %vm50_vm1 = vcmp.ge.f32.partialorder %v41_v19, 0.0  ;;  %v58_v26 = vmul.f32 0.2, %v40_v18 }
   0x8   :  { %v59_v27 = vmul.f32 0.2, %v41_v19  ;;  %vm51_vm2 = vcmp.ge.f32.partialorder %v42_v20, 0.0  ;;  %vm52_vm3 = vcmp.ge.f32.partialorder %v43_v21, 0.0  ;;  %v60_v28 = vmul.f32 0.2, %v42_v20 }
   0x9   :  { %v61_v29 = vmul.f32 0.2, %v43_v21  ;;  %v67_v30 = vsel %vm49_vm0, %v40_v18, %v58_v26  ;;  %vm53_vm4 = vcmp.ge.f32.partialorder %v44_v22, 0.0  ;;  %vm54_vm5 = vcmp.ge.f32.partialorder %v45_v23, 0.0 }
   0xa   :  { %v68_v31 = vsel %vm50_vm1, %v41_v19, %v59_v27  ;;  %v69_v34 = vsel %vm51_vm2, %v42_v20, %v60_v28  ;;  %v62_v36 = vmul.f32 0.2, %v44_v22  ;;  %v63_v38 = vmul.f32 0.2, %v45_v23 }
   0xb   :  { %v101_v33 = vpack.c.bf16 %v68_v31, %v67_v30  ;;  %v70_v35 = vsel %vm52_vm3, %v43_v21, %v61_v29  ;;  %vm55_vm6 = vcmp.ge.f32.partialorder %v46_v24, 0.0  ;;  %vm56_vm7 = vcmp.ge.f32.partialorder %v47_v25, 0.0 }
   0xc   :  { %v106_v37 = vpack.c.bf16 %v70_v35, %v69_v34  ;;  %v71_v39 = vsel %vm53_vm4, %v44_v22, %v62_v36  ;;  %v64_v40 = vmul.f32 0.2, %v46_v24  ;;  %v65_v41 = vmul.f32 0.2, %v47_v25 }
   0xd   :  { %102 = vst [vmem:[%s195_s3] sm:$0xff] %v101_v33   ;;  %v35_v42 = vmul.f32 %v121_v2, %v22_v32  ;;  %v72_v43 = vsel %vm54_vm5, %v45_v23, %v63_v38 }
   0xe   :  { %118 = vst [vmem:[%s195_s3 + $0x8] sm:$0xff] %v106_v37   ;;  %v111_v44 = vpack.c.bf16 %v72_v43, %v71_v39  ;;  %v73_v45 = vsel %vm55_vm6, %v46_v24, %v64_v40  ;;  %v74_v46 = vsel %vm56_vm7, %v47_v25, %v65_v41 }
   0xf   :  { %v48_v47 = vadd.f32 %v122_v3, %v35_v42  ;;  %v116_v48 = vpack.c.bf16 %v74_v46, %v73_v45 }
  0x10   :  { %119 = vst [vmem:[%s195_s3 + $0x10] sm:$0xff] %v111_v44  }
  0x11   :  { %vm57_vm8 = vcmp.ge.f32.partialorder %v48_v47, 0.0  ;;  %v66_v49 = vmul.f32 0.2, %v48_v47  ;;  %120 = vst [vmem:[%s195_s3 + $0x18] sm:$0xff] %v116_v48  }
  0x13   :  { %v75_v50 = vsel %vm57_vm8, %v48_v47, %v66_v49 }
  0x14   :  { %v84_v51 = vpack.c.bf16 %v75_v50, %v75_v50 }
  0x16   :  { %93 = vst [vmem:[%s195_s3 + $0x20] sm:$0xf] %v84_v51 }

// kernel: _lambda_.11
= control target key start
LH: loop header
LB: loop body
LE: loop exit
PB: predicated region body
PF: predicated region fallthrough
CT: control target
= control target key end

     0   :  { %vm361_vm0 = vcmask 1040384   ;;  %s657_s1 = inlined_call_operand.vmem [shape: bf16[256,128], index: 1, kind: input, shape index: {}]   ;;  %s658_s0 = inlined_call_operand.vmem [shape: bf16[72,256], index: 0, kind: input, shape index: {}]   ;;  %s659_s2 = inlined_call_operand.vmem [shape: f32[72,128], index: 2, kind: output, shape index: {0}]   ;;  %s660_s3 = inlined_call_operand.vmem [shape: f32[1,2,128], index: 3, kind: output, shape index: {1}]  }
   0x1   :  { %v483_v0 = vld [vmem:[%s657_s1 + $0x38] sm:$0xff]  ;;  %v482_v2 = vld [vmem:[%s657_s1 + $0x30] sm:$0xff]  ;;  %v481_v4 = vld [vmem:[%s657_s1 + $0x28] sm:$0xff] }
   0x2   :  { %v491_v1 = vld [vmem:[%s657_s1 + $0x78] sm:$0xff]  ;;  %219 = vmatpush.bf16.msra.mxu0 %v483_v0  ;;  %492 = vmatpush.bf16.msra.mxu2 %v483_v0  ;;  %v490_v3 = vld [vmem:[%s657_s1 + $0x70] sm:$0xff]  ;;  %v489_v5 = vld [vmem:[%s657_s1 + $0x68] sm:$0xff] }
   0x3   :  { %252 = vmatpush.bf16.msra.mxu1 %v491_v1  ;;  %500 = vmatpush.bf16.msra.mxu3 %v491_v1  ;;  %v480_v6 = vld [vmem:[%s657_s1 + $0x20] sm:$0xff]  ;;  %v479_v8 = vld [vmem:[%s657_s1 + $0x18] sm:$0xff]  ;;  %v478_v10 = vld [vmem:[%s657_s1 + $0x10] sm:$0xff] }
   0x4   :  { %v488_v7 = vld [vmem:[%s657_s1 + $0x60] sm:$0xff]  ;;  %v487_v9 = vld [vmem:[%s657_s1 + $0x58] sm:$0xff]  ;;  %v486_v11 = vld [vmem:[%s657_s1 + $0x50] sm:$0xff] }
   0x5   :  { %v477_v12 = vld [vmem:[%s657_s1 + $0x8] sm:$0xff]  ;;  %v476_v14 = vld [vmem:[%s657_s1] sm:$0xff]  ;;  %v474_v22 = vld [vmem:[%s658_s0 + $0x34] sm:$0xf] }
   0x6   :  { %220 = vmatpush.bf16.msra.mxu0 %v482_v2  ;;  %493 = vmatpush.bf16.msra.mxu2 %v482_v2  ;;  %v485_v13 = vld [vmem:[%s657_s1 + $0x48] sm:$0xff]  ;;  %v484_v15 = vld [vmem:[%s657_s1 + $0x40] sm:$0xff]  ;;  %v400_v23 = vld [vmem:[%s658_s0 + $0x38] sm:$0xf0] }
   0x7   :  { %253 = vmatpush.bf16.msra.mxu1 %v490_v3  ;;  %501 = vmatpush.bf16.msra.mxu3 %v490_v3  ;;  %v374_v16 = vld [vmem:[%s658_s0] sm:$0xf]  ;;  %v469_v17 = vld [vmem:[%s658_s0 + $0x4] sm:$0xf0]  ;;  %v468_v20 = vld [vmem:[%s658_s0 + $0x4] sm:$0xf]  ;;  %v403_v27 = vor.u32 %v474_v22, %v400_v23 }
   0x8   :  { %v390_v18 = vld [vmem:[%s658_s0 + $0x20] sm:$0xf]  ;;  %v473_v19 = vld [vmem:[%s658_s0 + $0x24] sm:$0xf0]  ;;  %v376_v21 = vld [vmem:[%s658_s0 + $0x8] sm:$0xf0]  ;;  %v375_v24 = vor.u32 %v469_v17, %v374_v16 }
   0x9   :  { %v391_v25 = vor.u32 %v473_v19, %v390_v18  ;;  %v379_v26 = vor.u32 %v468_v20, %v376_v21  ;;  %v43_v28 = vld [vmem:[%s658_s0 + $0x40] sm:$0xff]  ;;  %v382_v29 = vld [vmem:[%s658_s0 + $0x10] sm:$0xf]  ;;  %v471_v30 = vld [vmem:[%s658_s0 + $0x14] sm:$0xf0] }
   0xa   :  { %221 = vmatpush.bf16.msra.mxu0 %v481_v4  ;;  %494 = vmatpush.bf16.msra.mxu2 %v481_v4  ;;  %v398_v31 = vld [vmem:[%s658_s0 + $0x30] sm:$0xf]  ;;  %v475_v32 = vld [vmem:[%s658_s0 + $0x34] sm:$0xf0]  ;;  %v102_v33 = vunpack.c.h.b16 %v43_v28  ;;  %v470_v34 = vld [vmem:[%s658_s0 + $0x14] sm:$0xf]  ;;  %v383_v36 = vor.u32 %v471_v30, %v382_v29  ;;  %v101_v40 = vunpack.c.l.b16 %v43_v28 }
   0xb   :  { %254 = vmatpush.bf16.msra.mxu1 %v489_v5  ;;  %502 = vmatpush.bf16.msra.mxu3 %v489_v5  ;;  %v384_v35 = vld [vmem:[%s658_s0 + $0x18] sm:$0xf0]  ;;  %v399_v37 = vor.u32 %v475_v32, %v398_v31  ;;  %v472_v41 = vld [vmem:[%s658_s0 + $0x24] sm:$0xf]  ;;  %v392_v42 = vld [vmem:[%s658_s0 + $0x28] sm:$0xf0] }
   0xc   :  { %v387_v38 = vor.u32 %v470_v34, %v384_v35  ;;  %v112_v39 = vpack.c.b16 %v102_v33, %v102_v33  ;;  %v111_v43 = vpack.c.b16 %v101_v40, %v101_v40  ;;  %v395_v44 = vor.u32 %v472_v41, %v392_v42 }
   0xe   :  { %222 = vmatpush.bf16.msra.mxu0 %v480_v6  ;;  %495 = vmatpush.bf16.msra.mxu2 %v480_v6 }
   0xf   :  { %255 = vmatpush.bf16.msra.mxu1 %v488_v7  ;;  %503 = vmatpush.bf16.msra.mxu3 %v488_v7 }
  0x12   :  { %223 = vmatpush.bf16.msra.mxu0 %v479_v8  ;;  %496 = vmatpush.bf16.msra.mxu2 %v479_v8 }
  0x13   :  { %256 = vmatpush.bf16.msra.mxu1 %v487_v9  ;;  %504 = vmatpush.bf16.msra.mxu3 %v487_v9 }
  0x16   :  { %224 = vmatpush.bf16.msra.mxu0 %v478_v10  ;;  %497 = vmatpush.bf16.msra.mxu2 %v478_v10 }
  0x17   :  { %257 = vmatpush.bf16.msra.mxu1 %v486_v11  ;;  %505 = vmatpush.bf16.msra.mxu3 %v486_v11 }
  0x1a   :  { %225 = vmatpush.bf16.msra.mxu0 %v477_v12  ;;  %498 = vmatpush.bf16.msra.mxu2 %v477_v12 }
  0x1b   :  { %258 = vmatpush.bf16.msra.mxu1 %v485_v13  ;;  %506 = vmatpush.bf16.msra.mxu3 %v485_v13 }
  0x1e   :  { %226 = vmatpush.bf16.msra.mxu0 %v476_v14  ;;  %499 = vmatpush.bf16.msra.mxu2 %v476_v14 }
  0x1f   :  { %259 = vmatpush.bf16.msra.mxu1 %v484_v15  ;;  %507 = vmatpush.bf16.msra.mxu3 %v484_v15 }
  0x21   :  { %227 = vmatmul.bf16.vlgmr.msra.gmra.mxu0 %v375_v24  ;;  %237 = vmatmul.bf16.vlgmr.msra.gmra.mxu2 %v391_v25 }
  0x22   :  { %260 = vmatmul.bf16.vlgmr.msra.gmra.mxu1 %v379_v26  ;;  %275 = vmatmul.bf16.vlgmr.msra.gmra.mxu3 %v403_v27 }
  0x31   :  { %232 = vmatmul.bf16.gmra.mxu0 %v383_v36  ;;  %242 = vmatmul.bf16.gmra.mxu2 %v399_v37 }
  0x32   :  { %265 = vmatmul.bf16.gmra.mxu1 %v387_v38  ;;  %280 = vmatmul.bf16.gmra.mxu3 %v112_v39 }
  0x41   :  { %247 = vmatmul.bf16.gmra.mxu2 %v111_v43 }
  0x42   :  { %270 = vmatmul.bf16.gmra.mxu1 %v395_v44 }
  0x9e   :  { %v228_v45 = vpop.f32.mrf.mxu0 }
  0x9f   :  { %v261_v46 = vpop.f32.mrf.mxu1 }
  0xa0   :  { %v262_v47 = vadd.f32 %v261_v46, %v228_v45 }
  0xa2   :  { %315 = vst [vmem:[%s659_s2] sm:$0xff] %v262_v47  ;;  %v338_v6 = vmul.f32 %v262_v47, %v262_v47 }
  0xa4   :  { %v238_v48 = vpop.f32.mrf.mxu2 }
  0xa5   :  { %v276_v49 = vpop.f32.mrf.mxu3 }
  0xa6   :  { %v230_v50 = vpop.f32.mrf.mxu0 }
  0xa7   :  { %v263_v51 = vpop.f32.mrf.mxu1 }
  0xa8   :  { %v264_v52 = vadd.f32 %v263_v51, %v230_v50 }
  0xaa   :  { %316 = vst [vmem:[%s659_s2 + $0x8] sm:$0xff] %v264_v52  ;;  %v339_v4 = vmul.f32 %v264_v52, %v264_v52  ;;  %v324_v7 = vadd.f32 %v264_v52, %v262_v47 }
  0xac   :  { %v240_v53 = vpop.f32.mrf.mxu2  ;;  %v347_v9 = vadd.f32 %v339_v4, %v338_v6 }
  0xad   :  { %v278_v54 = vpop.f32.mrf.mxu3 }
  0xae   :  { %v233_v55 = vpop.f32.mrf.mxu0 }
  0xaf   :  { %v266_v56 = vpop.f32.mrf.mxu1 }
  0xb0   :  { %v267_v57 = vadd.f32 %v266_v56, %v233_v55 }
  0xb2   :  { %317 = vst [vmem:[%s659_s2 + $0x10] sm:$0xff] %v267_v57  ;;  %v340_v8 = vmul.f32 %v267_v57, %v267_v57  ;;  %v325_v10 = vadd.f32 %v324_v7, %v267_v57 }
  0xb4   :  { %v243_v58 = vpop.f32.mrf.mxu2  ;;  %v348_v14 = vadd.f32 %v347_v9, %v340_v8 }
  0xb5   :  { %v277_v59 = vadd.f32 %v276_v49, %v243_v58  ;;  %v281_v60 = vpop.f32.mrf.mxu3 }
  0xb6   :  { %v235_v61 = vpop.f32.mrf.mxu0 }
  0xb7   :  { %321 = vst [vmem:[%s659_s2 + $0x30] sm:$0xff] %v277_v59  ;;  %v268_v62 = vpop.f32.mrf.mxu1  ;;  %v344_v24 = vmul.f32 %v277_v59, %v277_v59 }
  0xb8   :  { %v269_v63 = vadd.f32 %v268_v62, %v235_v61 }
  0xba   :  { %318 = vst [vmem:[%s659_s2 + $0x18] sm:$0xff] %v269_v63  ;;  %v341_v11 = vmul.f32 %v269_v63, %v269_v63  ;;  %v326_v15 = vadd.f32 %v325_v10, %v269_v63 }
  0xbc   :  { %v245_v0 = vpop.f32.mrf.mxu2  ;;  %v349_v18 = vadd.f32 %v348_v14, %v341_v11 }
  0xbd   :  { %v279_v1 = vadd.f32 %v278_v54, %v245_v0  ;;  %v283_v2 = vpop.f32.mrf.mxu3 }
  0xbf   :  { %322 = vst [vmem:[%s659_s2 + $0x38] sm:$0xff] %v279_v1  ;;  %v271_v3 = vpop.f32.mrf.mxu1  ;;  %v345_v28 = vmul.f32 %v279_v1, %v279_v1 }
  0xc0   :  { %v272_v5 = vadd.f32 %v271_v3, %v238_v48 }
  0xc2   :  { %319 = vst [vmem:[%s659_s2 + $0x20] sm:$0xff] %v272_v5  ;;  %v342_v16 = vmul.f32 %v272_v5, %v272_v5  ;;  %v327_v19 = vadd.f32 %v326_v15, %v272_v5 }
  0xc4   :  { %v248_v12 = vpop.f32.mrf.mxu2  ;;  %v350_v21 = vadd.f32 %v349_v18, %v342_v16 }
  0xc5   :  { %v282_v13 = vadd.f32 %v281_v60, %v248_v12 }
  0xc7   :  { %323 = vst [vmem:[%s659_s2 + $0x40] sm:$0xff] %v282_v13  ;;  %v273_v17 = vpop.f32.mrf.mxu1  ;;  %v346_v29 = vmul.f32 %v282_v13, %v282_v13 }
  0xc8   :  { %v274_v20 = vadd.f32 %v273_v17, %v240_v53 }
  0xca   :  { %320 = vst [vmem:[%s659_s2 + $0x28] sm:$0xff] %v274_v20  ;;  %v328_v22 = vadd.f32 %v327_v19, %v274_v20  ;;  %v343_v23 = vmul.f32 %v274_v20, %v274_v20 }
  0xcc   :  { %v329_v25 = vadd.f32 %v328_v22, %v277_v59  ;;  %v351_v26 = vadd.f32 %v350_v21, %v343_v23  ;;  %v250_v27 = vpop.f32.mrf.mxu2 }
  0xce   :  { %v330_v30 = vadd.f32 %v329_v25, %v279_v1  ;;  %v352_v31 = vadd.f32 %v351_v26, %v344_v24 }
  0xd0   :  { %v331_v32 = vadd.f32 %v330_v30, %v282_v13  ;;  %v353_v33 = vadd.f32 %v352_v31, %v345_v28 }
  0xd2   :  { %v332_v34 = vrot.slane %v331_v32, 4  ;;  %v354_v35 = vadd.f32 %v353_v33, %v346_v29 }
  0xd4   :  { %v333_v36 = vadd.f32 %v332_v34, %v331_v32  ;;  %v355_v37 = vrot.slane %v354_v35, 4 }
  0xd6   :  { %v334_v38 = vrot.slane %v333_v36, 2  ;;  %v356_v39 = vadd.f32 %v355_v37, %v354_v35 }
  0xd8   :  { %v335_v40 = vadd.f32 %v334_v38, %v333_v36  ;;  %v357_v41 = vrot.slane %v356_v39, 2 }
  0xda   :  { %v336_v42 = vrot.slane %v335_v40, 1  ;;  %v358_v43 = vadd.f32 %v357_v41, %v356_v39 }
  0xdc   :  { %v359_v44 = vrot.slane %v358_v43, 1  ;;  %v337_v45 = vadd.f32 %v336_v42, %v335_v40 }
  0xde   :  { %v360_v46 = vadd.f32 %v359_v44, %v358_v43 }
  0xe0   :  { %v362_v47 = vsel %vm361_vm0, %v337_v45, %v360_v46 }
  0xe1   :  { %363 = vst [vmem:[%s660_s3] sm:$0x3] %v362_v47 }

// kernel: _lambda_.14
= control target key start
LH: loop header
LB: loop body
LE: loop exit
PB: predicated region body
PF: predicated region fallthrough
CT: control target
= control target key end

     0   :  { %s160_s0 = inlined_call_operand.vmem [shape: f32[56,128], index: 0, kind: input, shape index: {}]   ;;  %s161_s1 = inlined_call_operand.vmem [shape: f32[1,128], index: 1, kind: input, shape index: {}]   ;;  %s162_s2 = inlined_call_operand.vmem [shape: f32[1,128], index: 2, kind: input, shape index: {}]   ;;  %s163_s3 = inlined_call_operand.vmem [shape: bf16[56,128], index: 3, kind: output, shape index: {}]  }
   0x1   :  { %v14_v0 = vld [vmem:[%s160_s0] sm:$0xff]  ;;  %v15_v1 = vld [vmem:[%s160_s0 + $0x8] sm:$0xff]  ;;  %v16_v4 = vld [vmem:[%s160_s0 + $0x10] sm:$0xff] }
   0x2   :  { %v99_v2 = vld [vmem:[%s161_s1] ss:$0 sm:$0xff]  ;;  %v17_v5 = vld [vmem:[%s160_s0 + $0x18] sm:$0xff]  ;;  %v19_v11 = vld [vmem:[%s160_s0 + $0x28] sm:$0xff] }
   0x3   :  { %v100_v3 = vld [vmem:[%s162_s2] ss:$0 sm:$0xff]  ;;  %v25_v7 = vmul.f32 %v99_v2, %v14_v0  ;;  %v26_v8 = vmul.f32 %v99_v2, %v15_v1  ;;  %v27_v9 = vmul.f32 %v99_v2, %v16_v4  ;;  %v28_v10 = vmul.f32 %v99_v2, %v17_v5  ;;  %v20_v12 = vld [vmem:[%s160_s0 + $0x30] sm:$0xff] }
   0x4   :  { %v18_v6 = vld [vmem:[%s160_s0 + $0x20] sm:$0xff]  ;;  %v30_v14 = vmul.f32 %v99_v2, %v19_v11  ;;  %v31_v15 = vmul.f32 %v99_v2, %v20_v12 }
   0x5   :  { %v29_v13 = vmul.f32 %v99_v2, %v18_v6  ;;  %v36_v16 = vadd.f32 %v100_v3, %v25_v7  ;;  %v37_v17 = vadd.f32 %v100_v3, %v26_v8  ;;  %v38_v18 = vadd.f32 %v100_v3, %v27_v9 }
   0x6   :  { %v39_v19 = vadd.f32 %v100_v3, %v28_v10  ;;  %v41_v21 = vadd.f32 %v100_v3, %v30_v14  ;;  %v42_v22 = vadd.f32 %v100_v3, %v31_v15 }
   0x7   :  { %v40_v20 = vadd.f32 %v100_v3, %v29_v13  ;;  %vm43_vm0 = vcmp.ge.f32.partialorder %v36_v16, 0.0  ;;  %vm44_vm1 = vcmp.ge.f32.partialorder %v37_v17, 0.0  ;;  %v50_v23 = vmul.f32 0.2, %v36_v16 }
   0x8   :  { %v51_v24 = vmul.f32 0.2, %v37_v17  ;;  %vm45_vm2 = vcmp.ge.f32.partialorder %v38_v18, 0.0  ;;  %vm46_vm3 = vcmp.ge.f32.partialorder %v39_v19, 0.0  ;;  %v52_v25 = vmul.f32 0.2, %v38_v18 }
   0x9   :  { %v53_v26 = vmul.f32 0.2, %v39_v19  ;;  %v57_v27 = vsel %vm43_vm0, %v36_v16, %v50_v23  ;;  %vm47_vm4 = vcmp.ge.f32.partialorder %v40_v20, 0.0  ;;  %vm48_vm5 = vcmp.ge.f32.partialorder %v41_v21, 0.0 }
   0xa   :  { %v58_v28 = vsel %vm44_vm1, %v37_v17, %v51_v24  ;;  %v59_v30 = vsel %vm45_vm2, %v38_v18, %v52_v25  ;;  %v54_v32 = vmul.f32 0.2, %v40_v20  ;;  %v55_v34 = vmul.f32 0.2, %v41_v21 }
   0xb   :  { %v85_v29 = vpack.c.bf16 %v58_v28, %v57_v27  ;;  %v60_v31 = vsel %vm46_vm3, %v39_v19, %v53_v26  ;;  %vm49_vm6 = vcmp.ge.f32.partialorder %v42_v22, 0.0  ;;  %v56_v35 = vmul.f32 0.2, %v42_v22 }
   0xc   :  { %v90_v33 = vpack.c.bf16 %v60_v31, %v59_v30  ;;  %v61_v36 = vsel %vm47_vm4, %v40_v20, %v54_v32  ;;  %v62_v37 = vsel %vm48_vm5, %v41_v21, %v55_v34 }
   0xd   :  { %86 = vst [vmem:[%s163_s3] sm:$0xff] %v85_v29   ;;  %v63_v38 = vsel %vm49_vm6, %v42_v22, %v56_v35  ;;  %v95_v39 = vpack.c.bf16 %v62_v37, %v61_v36 }
   0xe   :  { %97 = vst [vmem:[%s163_s3 + $0x8] sm:$0xff] %v90_v33   ;;  %v70_v40 = vpack.c.bf16 %v63_v38, %v63_v38 }
   0xf   :  { %98 = vst [vmem:[%s163_s3 + $0x10] sm:$0xff] %v95_v39  }
  0x10   :  { %77 = vst [vmem:[%s163_s3 + $0x18] sm:$0xf] %v70_v40 }

// kernel: _lambda_.13
= control target key start
LH: loop header
LB: loop body
LE: loop exit
PB: predicated region body
PF: predicated region fallthrough
CT: control target
= control target key end

     0   :  { %vm549_vm0 = vcmask 1040384   ;;  %s998_s1 = inlined_call_operand.vmem [shape: bf16[512,128], index: 1, kind: input, shape index: {}]   ;;  %s999_s0 = inlined_call_operand.vmem [shape: bf16[56,512], index: 0, kind: input, shape index: {}]   ;;  %s1000_s2 = inlined_call_operand.vmem [shape: f32[56,128], index: 2, kind: output, shape index: {0}]   ;;  %s1001_s3 = inlined_call_operand.vmem [shape: f32[1,2,128], index: 3, kind: output, shape index: {1}]  }
   0x1   :  { %v755_v0 = vld [vmem:[%s998_s1 + $0x38] sm:$0xff]  ;;  %v754_v4 = vld [vmem:[%s998_s1 + $0x30] sm:$0xff]  ;;  %v753_v8 = vld [vmem:[%s998_s1 + $0x28] sm:$0xff] }
   0x2   :  { %v763_v1 = vld [vmem:[%s998_s1 + $0x78] sm:$0xff]  ;;  %375 = vmatpush.bf16.msra.mxu0 %v755_v0  ;;  %v762_v5 = vld [vmem:[%s998_s1 + $0x70] sm:$0xff]  ;;  %v761_v9 = vld [vmem:[%s998_s1 + $0x68] sm:$0xff] }
   0x3   :  { %v771_v2 = vld [vmem:[%s998_s1 + $0xb8] sm:$0xff]  ;;  %403 = vmatpush.bf16.msra.mxu1 %v763_v1  ;;  %v770_v6 = vld [vmem:[%s998_s1 + $0xb0] sm:$0xff]  ;;  %v769_v10 = vld [vmem:[%s998_s1 + $0xa8] sm:$0xff] }
   0x4   :  { %v779_v3 = vld [vmem:[%s998_s1 + $0xf8] sm:$0xff]  ;;  %431 = vmatpush.bf16.msra.mxu2 %v771_v2  ;;  %v778_v7 = vld [vmem:[%s998_s1 + $0xf0] sm:$0xff]  ;;  %v777_v11 = vld [vmem:[%s998_s1 + $0xe8] sm:$0xff] }
   0x5   :  { %459 = vmatpush.bf16.msra.mxu3 %v779_v3  ;;  %v752_v12 = vld [vmem:[%s998_s1 + $0x20] sm:$0xff]  ;;  %v751_v16 = vld [vmem:[%s998_s1 + $0x18] sm:$0xff]  ;;  %v750_v20 = vld [vmem:[%s998_s1 + $0x10] sm:$0xff] }
   0x6   :  { %376 = vmatpush.bf16.msra.mxu0 %v754_v4  ;;  %v760_v13 = vld [vmem:[%s998_s1 + $0x60] sm:$0xff]  ;;  %v759_v17 = vld [vmem:[%s998_s1 + $0x58] sm:$0xff]  ;;  %v758_v21 = vld [vmem:[%s998_s1 + $0x50] sm:$0xff] }
   0x7   :  { %404 = vmatpush.bf16.msra.mxu1 %v762_v5  ;;  %v768_v14 = vld [vmem:[%s998_s1 + $0xa0] sm:$0xff]  ;;  %v767_v18 = vld [vmem:[%s998_s1 + $0x98] sm:$0xff]  ;;  %v766_v22 = vld [vmem:[%s998_s1 + $0x90] sm:$0xff] }
   0x8   :  { %432 = vmatpush.bf16.msra.mxu2 %v770_v6  ;;  %v776_v15 = vld [vmem:[%s998_s1 + $0xe0] sm:$0xff]  ;;  %v775_v19 = vld [vmem:[%s998_s1 + $0xd8] sm:$0xff]  ;;  %v774_v23 = vld [vmem:[%s998_s1 + $0xd0] sm:$0xff] }
   0x9   :  { %460 = vmatpush.bf16.msra.mxu3 %v778_v7  ;;  %v749_v24 = vld [vmem:[%s998_s1 + $0x8] sm:$0xff]  ;;  %v748_v28 = vld [vmem:[%s998_s1] sm:$0xff]  ;;  %v738_v33 = vld [vmem:[%s999_s0 + $0xc] sm:$0xf0] }
   0xa   :  { %377 = vmatpush.bf16.msra.mxu0 %v753_v8  ;;  %v757_v25 = vld [vmem:[%s998_s1 + $0x48] sm:$0xff]  ;;  %v756_v29 = vld [vmem:[%s998_s1 + $0x40] sm:$0xff]  ;;  %v564_v35 = vld [vmem:[%s999_s0 + $0x10] sm:$0xf0] }
   0xb   :  { %405 = vmatpush.bf16.msra.mxu1 %v761_v9  ;;  %v765_v26 = vld [vmem:[%s998_s1 + $0x88] sm:$0xff]  ;;  %v764_v30 = vld [vmem:[%s998_s1 + $0x80] sm:$0xff]  ;;  %v739_v37 = vld [vmem:[%s999_s0 + $0x14] sm:$0xf0] }
   0xc   :  { %433 = vmatpush.bf16.msra.mxu2 %v769_v10  ;;  %v773_v27 = vld [vmem:[%s998_s1 + $0xc8] sm:$0xff]  ;;  %v772_v31 = vld [vmem:[%s998_s1 + $0xc0] sm:$0xff]  ;;  %v572_v39 = vld [vmem:[%s999_s0 + $0x18] sm:$0xf0] }
   0xd   :  { %461 = vmatpush.bf16.msra.mxu3 %v777_v11  ;;  %v562_v32 = vld [vmem:[%s999_s0] sm:$0xf]  ;;  %v736_v34 = vld [vmem:[%s999_s0 + $0x4] sm:$0xf]  ;;  %v570_v36 = vld [vmem:[%s999_s0 + $0x8] sm:$0xf] }
   0xe   :  { %378 = vmatpush.bf16.msra.mxu0 %v752_v12  ;;  %v737_v38 = vld [vmem:[%s999_s0 + $0xc] sm:$0xf]  ;;  %v563_v40 = vor.u32 %v738_v33, %v562_v32  ;;  %v567_v41 = vor.u32 %v736_v34, %v564_v35  ;;  %v571_v42 = vor.u32 %v739_v37, %v570_v36  ;;  %v578_v44 = vld [vmem:[%s999_s0 + $0x20] sm:$0xf]  ;;  %v742_v45 = vld [vmem:[%s999_s0 + $0x2c] sm:$0xf0] }
   0xf   :  { %406 = vmatpush.bf16.msra.mxu1 %v760_v13  ;;  %v575_v43 = vor.u32 %v737_v38, %v572_v39  ;;  %v740_v46 = vld [vmem:[%s999_s0 + $0x24] sm:$0xf]  ;;  %v580_v47 = vld [vmem:[%s999_s0 + $0x30] sm:$0xf0]  ;;  %v586_v48 = vld [vmem:[%s999_s0 + $0x28] sm:$0xf]  ;;  %v579_v52 = vor.u32 %v742_v45, %v578_v44 }
  0x10   :  { %434 = vmatpush.bf16.msra.mxu2 %v768_v14  ;;  %v743_v49 = vld [vmem:[%s999_s0 + $0x34] sm:$0xf0]  ;;  %v741_v50 = vld [vmem:[%s999_s0 + $0x2c] sm:$0xf]  ;;  %v588_v51 = vld [vmem:[%s999_s0 + $0x38] sm:$0xf0]  ;;  %v583_v53 = vor.u32 %v740_v46, %v580_v47 }
  0x11   :  { %462 = vmatpush.bf16.msra.mxu3 %v776_v15  ;;  %v587_v54 = vor.u32 %v743_v49, %v586_v48  ;;  %v591_v55 = vor.u32 %v741_v50, %v588_v51  ;;  %v594_v56 = vld [vmem:[%s999_s0 + $0x40] sm:$0xf]  ;;  %v746_v57 = vld [vmem:[%s999_s0 + $0x4c] sm:$0xf0]  ;;  %v744_v58 = vld [vmem:[%s999_s0 + $0x44] sm:$0xf] }
  0x12   :  { %379 = vmatpush.bf16.msra.mxu0 %v751_v16  ;;  %v596_v59 = vld [vmem:[%s999_s0 + $0x50] sm:$0xf0]  ;;  %v602_v60 = vld [vmem:[%s999_s0 + $0x48] sm:$0xf]  ;;  %v747_v61 = vld [vmem:[%s999_s0 + $0x54] sm:$0xf0]  ;;  %v595_v0 = vor.u32 %v746_v57, %v594_v56 }
  0x13   :  { %407 = vmatpush.bf16.msra.mxu1 %v759_v17  ;;  %v745_v62 = vld [vmem:[%s999_s0 + $0x4c] sm:$0xf]  ;;  %v604_v63 = vld [vmem:[%s999_s0 + $0x58] sm:$0xf0]  ;;  %v599_v1 = vor.u32 %v744_v58, %v596_v59  ;;  %v603_v2 = vor.u32 %v747_v61, %v602_v60  ;;  %v43_v4 = vld [vmem:[%s999_s0 + $0x60] sm:$0xff] }
  0x14   :  { %435 = vmatpush.bf16.msra.mxu2 %v767_v18  ;;  %v607_v3 = vor.u32 %v745_v62, %v604_v63  ;;  %v44_v5 = vld [vmem:[%s999_s0 + $0x68] sm:$0xff]  ;;  %v147_v6 = vunpack.c.l.b16 %v43_v4  ;;  %v148_v7 = vunpack.c.h.b16 %v43_v4 }
  0x15   :  { %463 = vmatpush.bf16.msra.mxu3 %v775_v19  ;;  %v149_v8 = vunpack.c.l.b16 %v44_v5  ;;  %v150_v9 = vunpack.c.h.b16 %v44_v5 }
  0x16   :  { %380 = vmatpush.bf16.msra.mxu0 %v750_v20  ;;  %v163_v10 = vpack.c.b16 %v147_v6, %v147_v6  ;;  %v164_v11 = vpack.c.b16 %v148_v7, %v148_v7 }
  0x17   :  { %408 = vmatpush.bf16.msra.mxu1 %v758_v21  ;;  %v165_v12 = vpack.c.b16 %v149_v8, %v149_v8  ;;  %v166_v13 = vpack.c.b16 %v150_v9, %v150_v9 }
  0x18   :  { %436 = vmatpush.bf16.msra.mxu2 %v766_v22 }
  0x19   :  { %464 = vmatpush.bf16.msra.mxu3 %v774_v23 }
  0x1a   :  { %381 = vmatpush.bf16.msra.mxu0 %v749_v24 }
  0x1b   :  { %409 = vmatpush.bf16.msra.mxu1 %v757_v25 }
  0x1c   :  { %437 = vmatpush.bf16.msra.mxu2 %v765_v26 }
  0x1d   :  { %465 = vmatpush.bf16.msra.mxu3 %v773_v27 }
  0x1e   :  { %382 = vmatpush.bf16.msra.mxu0 %v748_v28 }
  0x1f   :  { %410 = vmatpush.bf16.msra.mxu1 %v756_v29 }
  0x20   :  { %438 = vmatpush.bf16.msra.mxu2 %v764_v30 }
  0x21   :  { %466 = vmatpush.bf16.msra.mxu3 %v772_v31  ;;  %383 = vmatmul.bf16.vlgmr.msra.gmra.mxu0 %v563_v40 }
  0x22   :  { %411 = vmatmul.bf16.vlgmr.msra.gmra.mxu1 %v567_v41 }
  0x23   :  { %439 = vmatmul.bf16.vlgmr.msra.gmra.mxu2 %v571_v42 }
  0x24   :  { %467 = vmatmul.bf16.vlgmr.msra.gmra.mxu3 %v575_v43 }
  0x31   :  { %388 = vmatmul.bf16.gmra.mxu0 %v579_v52 }
  0x32   :  { %416 = vmatmul.bf16.gmra.mxu1 %v583_v53 }
  0x33   :  { %444 = vmatmul.bf16.gmra.mxu2 %v587_v54 }
  0x34   :  { %472 = vmatmul.bf16.gmra.mxu3 %v591_v55 }
  0x41   :  { %393 = vmatmul.bf16.gmra.mxu0 %v595_v0 }
  0x42   :  { %421 = vmatmul.bf16.gmra.mxu1 %v599_v1 }
  0x43   :  { %449 = vmatmul.bf16.gmra.mxu2 %v603_v2 }
  0x44   :  { %477 = vmatmul.bf16.gmra.mxu3 %v607_v3 }
  0x51   :  { %398 = vmatmul.bf16.gmra.mxu0 %v163_v10 }
  0x52   :  { %426 = vmatmul.bf16.gmra.mxu1 %v164_v11 }
  0x53   :  { %454 = vmatmul.bf16.gmra.mxu2 %v165_v12 }
  0x54   :  { %482 = vmatmul.bf16.gmra.mxu3 %v166_v13 }
  0x9e   :  { %v384_v14 = vpop.f32.mrf.mxu0 }
  0x9f   :  { %v412_v15 = vpop.f32.mrf.mxu1 }
  0xa0   :  { %v413_v16 = vadd.f32 %v412_v15, %v384_v14 }
  0xa6   :  { %v440_v17 = vpop.f32.mrf.mxu2  ;;  %v386_v20 = vpop.f32.mrf.mxu0 }
  0xa7   :  { %v468_v18 = vpop.f32.mrf.mxu3  ;;  %v441_v19 = vadd.f32 %v440_v17, %v413_v16  ;;  %v414_v21 = vpop.f32.mrf.mxu1 }
  0xa8   :  { %v415_v23 = vadd.f32 %v414_v21, %v386_v20 }
  0xa9   :  { %v469_v22 = vadd.f32 %v468_v18, %v441_v19 }
  0xab   :  { %511 = vst [vmem:[%s1000_s2] sm:$0xff] %v469_v22  ;;  %v530_v58 = vmul.f32 %v469_v22, %v469_v22 }
  0xae   :  { %v442_v24 = vpop.f32.mrf.mxu2  ;;  %v389_v27 = vpop.f32.mrf.mxu0 }
  0xaf   :  { %v470_v25 = vpop.f32.mrf.mxu3  ;;  %v443_v26 = vadd.f32 %v442_v24, %v415_v23  ;;  %v417_v28 = vpop.f32.mrf.mxu1 }
  0xb0   :  { %v418_v30 = vadd.f32 %v417_v28, %v389_v27 }
  0xb1   :  { %v471_v29 = vadd.f32 %v470_v25, %v443_v26 }
  0xb3   :  { %512 = vst [vmem:[%s1000_s2 + $0x8] sm:$0xff] %v471_v29  ;;  %v531_v54 = vmul.f32 %v471_v29, %v471_v29  ;;  %v518_v59 = vadd.f32 %v471_v29, %v469_v22 }
  0xb5   :  { %v537_v62 = vadd.f32 %v531_v54, %v530_v58 }
  0xb6   :  { %v445_v31 = vpop.f32.mrf.mxu2  ;;  %v391_v34 = vpop.f32.mrf.mxu0 }
  0xb7   :  { %v473_v32 = vpop.f32.mrf.mxu3  ;;  %v446_v33 = vadd.f32 %v445_v31, %v418_v30  ;;  %v419_v35 = vpop.f32.mrf.mxu1 }
  0xb8   :  { %v420_v37 = vadd.f32 %v419_v35, %v391_v34 }
  0xb9   :  { %v474_v36 = vadd.f32 %v473_v32, %v446_v33 }
  0xbb   :  { %513 = vst [vmem:[%s1000_s2 + $0x10] sm:$0xff] %v474_v36  ;;  %v532_v60 = vmul.f32 %v474_v36, %v474_v36  ;;  %v519_v63 = vadd.f32 %v518_v59, %v474_v36 }
  0xbd   :  { %v538_v2 = vadd.f32 %v537_v62, %v532_v60 }
  0xbe   :  { %v447_v38 = vpop.f32.mrf.mxu2  ;;  %v394_v41 = vpop.f32.mrf.mxu0 }
  0xbf   :  { %v475_v39 = vpop.f32.mrf.mxu3  ;;  %v448_v40 = vadd.f32 %v447_v38, %v420_v37  ;;  %v422_v42 = vpop.f32.mrf.mxu1 }
  0xc0   :  { %v423_v44 = vadd.f32 %v422_v42, %v394_v41 }
  0xc1   :  { %v476_v43 = vadd.f32 %v475_v39, %v448_v40 }
  0xc3   :  { %514 = vst [vmem:[%s1000_s2 + $0x18] sm:$0xff] %v476_v43  ;;  %v533_v0 = vmul.f32 %v476_v43, %v476_v43  ;;  %v520_v3 = vadd.f32 %v519_v63, %v476_v43 }
  0xc5   :  { %v539_v7 = vadd.f32 %v538_v2, %v533_v0 }
  0xc6   :  { %v450_v45 = vpop.f32.mrf.mxu2  ;;  %v396_v48 = vpop.f32.mrf.mxu0 }
  0xc7   :  { %v478_v46 = vpop.f32.mrf.mxu3  ;;  %v451_v47 = vadd.f32 %v450_v45, %v423_v44  ;;  %v424_v49 = vpop.f32.mrf.mxu1 }
  0xc8   :  { %v425_v51 = vadd.f32 %v424_v49, %v396_v48 }
  0xc9   :  { %v479_v50 = vadd.f32 %v478_v46, %v451_v47 }
  0xcb   :  { %515 = vst [vmem:[%s1000_s2 + $0x20] sm:$0xff] %v479_v50  ;;  %v534_v4 = vmul.f32 %v479_v50, %v479_v50  ;;  %v521_v8 = vadd.f32 %v520_v3, %v479_v50 }
  0xcd   :  { %v540_v13 = vadd.f32 %v539_v7, %v534_v4 }
  0xce   :  { %v452_v52 = vpop.f32.mrf.mxu2  ;;  %v399_v56 = vpop.f32.mrf.mxu0 }
  0xcf   :  { %v480_v53 = vpop.f32.mrf.mxu3  ;;  %v453_v55 = vadd.f32 %v452_v52, %v425_v51  ;;  %v427_v57 = vpop.f32.mrf.mxu1 }
  0xd0   :  { %v428_v1 = vadd.f32 %v427_v57, %v399_v56 }
  0xd1   :  { %v481_v61 = vadd.f32 %v480_v53, %v453_v55 }
  0xd3   :  { %516 = vst [vmem:[%s1000_s2 + $0x28] sm:$0xff] %v481_v61  ;;  %v535_v9 = vmul.f32 %v481_v61, %v481_v61  ;;  %v522_v14 = vadd.f32 %v521_v8, %v481_v61 }
  0xd5   :  { %v541_v16 = vadd.f32 %v540_v13, %v535_v9 }
  0xd6   :  { %v455_v5 = vpop.f32.mrf.mxu2  ;;  %v401_v11 = vpop.f32.mrf.mxu0 }
  0xd7   :  { %v483_v6 = vpop.f32.mrf.mxu3  ;;  %v456_v10 = vadd.f32 %v455_v5, %v428_v1  ;;  %v429_v12 = vpop.f32.mrf.mxu1 }
  0xd9   :  { %v484_v15 = vadd.f32 %v483_v6, %v456_v10 }
  0xdb   :  { %517 = vst [vmem:[%s1000_s2 + $0x30] sm:$0xff] %v484_v15  ;;  %v523_v17 = vadd.f32 %v522_v14, %v484_v15  ;;  %v536_v18 = vmul.f32 %v484_v15, %v484_v15 }
  0xdd   :  { %v524_v19 = vrot.slane %v523_v17, 4  ;;  %v542_v20 = vadd.f32 %v541_v16, %v536_v18 }
  0xde   :  { %v457_v21 = vpop.f32.mrf.mxu2 }
  0xdf   :  { %v485_v22 = vpop.f32.mrf.mxu3  ;;  %v525_v23 = vadd.f32 %v524_v19, %v523_v17  ;;  %v543_v24 = vrot.slane %v542_v20, 4 }
  0xe1   :  { %v526_v25 = vrot.slane %v525_v23, 2  ;;  %v544_v26 = vadd.f32 %v543_v24, %v542_v20 }
  0xe3   :  { %v527_v27 = vadd.f32 %v526_v25, %v525_v23  ;;  %v545_v28 = vrot.slane %v544_v26, 2 }
  0xe5   :  { %v528_v29 = vrot.slane %v527_v27, 1  ;;  %v546_v30 = vadd.f32 %v545_v28, %v544_v26 }
  0xe7   :  { %v547_v31 = vrot.slane %v546_v30, 1  ;;  %v529_v32 = vadd.f32 %v528_v29, %v527_v27 }
  0xe9   :  { %v548_v33 = vadd.f32 %v547_v31, %v546_v30 }
  0xeb   :  { %v550_v34 = vsel %vm549_vm0, %v529_v32, %v548_v33 }
  0xec   :  { %551 = vst [vmem:[%s1001_s3] sm:$0x3] %v550_v34 }

// kernel: _lambda_.15
= control target key start
LH: loop header
LB: loop body
LE: loop exit
PB: predicated region body
PF: predicated region fallthrough
CT: control target
= control target key end

     0   :  { %s1541_s1 = inlined_call_operand.vmem [shape: bf16[1024,128], index: 1, kind: input, shape index: {}]   ;;  %s1542_s0 = inlined_call_operand.vmem [shape: bf16[32,1024], index: 0, kind: input, shape index: {}]   ;;  %s1543_s2 = inlined_call_operand.vmem [shape: f32[1,128], index: 2, kind: input, shape index: {}]   ;;  %s1544_s3 = inlined_call_operand.vmem [shape: f32[32,128], index: 3, kind: output, shape index: {}]  }
   0x1   :  { %v1160_v0 = vld [vmem:[%s1541_s1 + $0x38] sm:$0xff]  ;;  %v1159_v4 = vld [vmem:[%s1541_s1 + $0x30] sm:$0xff]  ;;  %v1158_v8 = vld [vmem:[%s1541_s1 + $0x28] sm:$0xff] }
   0x2   :  { %v1168_v1 = vld [vmem:[%s1541_s1 + $0x78] sm:$0xff]  ;;  %634 = vmatpush.bf16.msra.mxu0 %v1160_v0  ;;  %v1167_v5 = vld [vmem:[%s1541_s1 + $0x70] sm:$0xff]  ;;  %v1166_v9 = vld [vmem:[%s1541_s1 + $0x68] sm:$0xff] }
   0x3   :  { %v1176_v2 = vld [vmem:[%s1541_s1 + $0xb8] sm:$0xff]  ;;  %653 = vmatpush.bf16.msra.mxu1 %v1168_v1  ;;  %v1175_v6 = vld [vmem:[%s1541_s1 + $0xb0] sm:$0xff]  ;;  %v1174_v10 = vld [vmem:[%s1541_s1 + $0xa8] sm:$0xff] }
   0x4   :  { %v1184_v3 = vld [vmem:[%s1541_s1 + $0xf8] sm:$0xff]  ;;  %672 = vmatpush.bf16.msra.mxu2 %v1176_v2  ;;  %v1183_v7 = vld [vmem:[%s1541_s1 + $0xf0] sm:$0xff]  ;;  %v1182_v11 = vld [vmem:[%s1541_s1 + $0xe8] sm:$0xff] }
   0x5   :  { %691 = vmatpush.bf16.msra.mxu3 %v1184_v3  ;;  %v1157_v12 = vld [vmem:[%s1541_s1 + $0x20] sm:$0xff]  ;;  %v1156_v16 = vld [vmem:[%s1541_s1 + $0x18] sm:$0xff]  ;;  %v1155_v20 = vld [vmem:[%s1541_s1 + $0x10] sm:$0xff] }
   0x6   :  { %635 = vmatpush.bf16.msra.mxu0 %v1159_v4  ;;  %v1165_v13 = vld [vmem:[%s1541_s1 + $0x60] sm:$0xff]  ;;  %v1164_v17 = vld [vmem:[%s1541_s1 + $0x58] sm:$0xff]  ;;  %v1163_v21 = vld [vmem:[%s1541_s1 + $0x50] sm:$0xff] }
   0x7   :  { %654 = vmatpush.bf16.msra.mxu1 %v1167_v5  ;;  %v1173_v14 = vld [vmem:[%s1541_s1 + $0xa0] sm:$0xff]  ;;  %v1172_v18 = vld [vmem:[%s1541_s1 + $0x98] sm:$0xff]  ;;  %v1171_v22 = vld [vmem:[%s1541_s1 + $0x90] sm:$0xff] }
   0x8   :  { %673 = vmatpush.bf16.msra.mxu2 %v1175_v6  ;;  %v1181_v15 = vld [vmem:[%s1541_s1 + $0xe0] sm:$0xff]  ;;  %v1180_v19 = vld [vmem:[%s1541_s1 + $0xd8] sm:$0xff]  ;;  %v1179_v23 = vld [vmem:[%s1541_s1 + $0xd0] sm:$0xff] }
   0x9   :  { %692 = vmatpush.bf16.msra.mxu3 %v1183_v7  ;;  %v1154_v24 = vld [vmem:[%s1541_s1 + $0x8] sm:$0xff]  ;;  %v1153_v28 = vld [vmem:[%s1541_s1] sm:$0xff]  ;;  %v1208_v40 = vld [vmem:[%s1541_s1 + $0x1b8] sm:$0xff] }
   0xa   :  { %636 = vmatpush.bf16.msra.mxu0 %v1158_v8  ;;  %v1162_v25 = vld [vmem:[%s1541_s1 + $0x48] sm:$0xff]  ;;  %v1161_v29 = vld [vmem:[%s1541_s1 + $0x40] sm:$0xff]  ;;  %v1192_v41 = vld [vmem:[%s1541_s1 + $0x138] sm:$0xff] }
   0xb   :  { %655 = vmatpush.bf16.msra.mxu1 %v1166_v9  ;;  %v1170_v26 = vld [vmem:[%s1541_s1 + $0x88] sm:$0xff]  ;;  %v1169_v30 = vld [vmem:[%s1541_s1 + $0x80] sm:$0xff]  ;;  %v1200_v46 = vld [vmem:[%s1541_s1 + $0x178] sm:$0xff] }
   0xc   :  { %674 = vmatpush.bf16.msra.mxu2 %v1174_v10  ;;  %v1178_v27 = vld [vmem:[%s1541_s1 + $0xc8] sm:$0xff]  ;;  %v1177_v31 = vld [vmem:[%s1541_s1 + $0xc0] sm:$0xff]  ;;  %v1216_v47 = vld [vmem:[%s1541_s1 + $0x1f8] sm:$0xff] }
   0xd   :  { %693 = vmatpush.bf16.msra.mxu3 %v1182_v11  ;;  %v819_v32 = vld [vmem:[%s1542_s0] sm:$0xf]  ;;  %v1137_v34 = vld [vmem:[%s1542_s0 + $0x4] sm:$0xf]  ;;  %v827_v36 = vld [vmem:[%s1542_s0 + $0x8] sm:$0xf] }
   0xe   :  { %637 = vmatpush.bf16.msra.mxu0 %v1157_v12  ;;  %v1141_v33 = vld [vmem:[%s1542_s0 + $0x1c] sm:$0xf0]  ;;  %v821_v35 = vld [vmem:[%s1542_s0 + $0x20] sm:$0xf0]  ;;  %v1142_v37 = vld [vmem:[%s1542_s0 + $0x24] sm:$0xf0] }
   0xf   :  { %656 = vmatpush.bf16.msra.mxu1 %v1165_v13  ;;  %v1138_v38 = vld [vmem:[%s1542_s0 + $0xc] sm:$0xf]  ;;  %v820_v42 = vor.u32 %v1141_v33, %v819_v32  ;;  %v824_v43 = vor.u32 %v1137_v34, %v821_v35  ;;  %v828_v44 = vor.u32 %v1142_v37, %v827_v36  ;;  %v1207_v48 = vld [vmem:[%s1541_s1 + $0x1b0] sm:$0xff]  ;;  %v1205_v56 = vld [vmem:[%s1541_s1 + $0x1a0] sm:$0xff] }
  0x10   :  { %675 = vmatpush.bf16.msra.mxu2 %v1173_v14  ;;  %v829_v39 = vld [vmem:[%s1542_s0 + $0x28] sm:$0xf0]  ;;  %v1191_v49 = vld [vmem:[%s1541_s1 + $0x130] sm:$0xff]  ;;  %v1189_v57 = vld [vmem:[%s1541_s1 + $0x120] sm:$0xff] }
  0x11   :  { %694 = vmatpush.bf16.msra.mxu3 %v1181_v15  ;;  %v832_v45 = vor.u32 %v1138_v38, %v829_v39  ;;  %v1199_v50 = vld [vmem:[%s1541_s1 + $0x170] sm:$0xff]  ;;  %v1206_v52 = vld [vmem:[%s1541_s1 + $0x1a8] sm:$0xff]  ;;  %v1197_v58 = vld [vmem:[%s1541_s1 + $0x160] sm:$0xff] }
  0x12   :  { %638 = vmatpush.bf16.msra.mxu0 %v1156_v16  ;;  %v1215_v51 = vld [vmem:[%s1541_s1 + $0x1f0] sm:$0xff]  ;;  %v1190_v53 = vld [vmem:[%s1541_s1 + $0x128] sm:$0xff]  ;;  %v1213_v59 = vld [vmem:[%s1541_s1 + $0x1e0] sm:$0xff] }
  0x13   :  { %657 = vmatpush.bf16.msra.mxu1 %v1164_v17  ;;  %v1198_v54 = vld [vmem:[%s1541_s1 + $0x168] sm:$0xff]  ;;  %v851_v60 = vld [vmem:[%s1542_s0 + $0x40] sm:$0xf]  ;;  %v1145_v62 = vld [vmem:[%s1542_s0 + $0x44] sm:$0xf] }
  0x14   :  { %676 = vmatpush.bf16.msra.mxu2 %v1172_v18  ;;  %v1214_v55 = vld [vmem:[%s1541_s1 + $0x1e8] sm:$0xff]  ;;  %v1149_v61 = vld [vmem:[%s1542_s0 + $0x5c] sm:$0xf0]  ;;  %v853_v63 = vld [vmem:[%s1542_s0 + $0x60] sm:$0xf0] }
  0x15   :  { %695 = vmatpush.bf16.msra.mxu3 %v1180_v19  ;;  %v859_v0 = vld [vmem:[%s1542_s0 + $0x48] sm:$0xf]  ;;  %v1146_v2 = vld [vmem:[%s1542_s0 + $0x4c] sm:$0xf]  ;;  %v1204_v4 = vld [vmem:[%s1541_s1 + $0x198] sm:$0xff]  ;;  %v852_v6 = vor.u32 %v1149_v61, %v851_v60  ;;  %v856_v7 = vor.u32 %v1145_v62, %v853_v63 }
  0x16   :  { %639 = vmatpush.bf16.msra.mxu0 %v1155_v20  ;;  %v1150_v1 = vld [vmem:[%s1542_s0 + $0x64] sm:$0xf0]  ;;  %v861_v3 = vld [vmem:[%s1542_s0 + $0x68] sm:$0xf0]  ;;  %v1188_v5 = vld [vmem:[%s1541_s1 + $0x118] sm:$0xff] }
  0x17   :  { %658 = vmatpush.bf16.msra.mxu1 %v1163_v21  ;;  %v860_v8 = vor.u32 %v1150_v1, %v859_v0  ;;  %v864_v9 = vor.u32 %v1146_v2, %v861_v3  ;;  %v1196_v10 = vld [vmem:[%s1541_s1 + $0x158] sm:$0xff]  ;;  %v1203_v12 = vld [vmem:[%s1541_s1 + $0x190] sm:$0xff]  ;;  %v1202_v16 = vld [vmem:[%s1541_s1 + $0x188] sm:$0xff] }
  0x18   :  { %677 = vmatpush.bf16.msra.mxu2 %v1171_v22  ;;  %v1212_v11 = vld [vmem:[%s1541_s1 + $0x1d8] sm:$0xff]  ;;  %v1187_v13 = vld [vmem:[%s1541_s1 + $0x110] sm:$0xff]  ;;  %v1186_v17 = vld [vmem:[%s1541_s1 + $0x108] sm:$0xff] }
  0x19   :  { %696 = vmatpush.bf16.msra.mxu3 %v1179_v23  ;;  %v1195_v14 = vld [vmem:[%s1541_s1 + $0x150] sm:$0xff]  ;;  %v1194_v18 = vld [vmem:[%s1541_s1 + $0x148] sm:$0xff]  ;;  %v1201_v20 = vld [vmem:[%s1541_s1 + $0x180] sm:$0xff] }
  0x1a   :  { %640 = vmatpush.bf16.msra.mxu0 %v1154_v24  ;;  %v1211_v15 = vld [vmem:[%s1541_s1 + $0x1d0] sm:$0xff]  ;;  %v1210_v19 = vld [vmem:[%s1541_s1 + $0x1c8] sm:$0xff]  ;;  %v1185_v21 = vld [vmem:[%s1541_s1 + $0x100] sm:$0xff] }
  0x1b   :  { %659 = vmatpush.bf16.msra.mxu1 %v1162_v25  ;;  %v1193_v22 = vld [vmem:[%s1541_s1 + $0x140] sm:$0xff]  ;;  %v835_v24 = vld [vmem:[%s1542_s0 + $0x10] sm:$0xf]  ;;  %v1147_v38 = vld [vmem:[%s1542_s0 + $0x54] sm:$0xf] }
  0x1c   :  { %678 = vmatpush.bf16.msra.mxu2 %v1170_v26  ;;  %v1209_v23 = vld [vmem:[%s1541_s1 + $0x1c0] sm:$0xff]  ;;  %v1143_v25 = vld [vmem:[%s1542_s0 + $0x2c] sm:$0xf0]  ;;  %v1139_v26 = vld [vmem:[%s1542_s0 + $0x14] sm:$0xf] }
  0x1d   :  { %697 = vmatpush.bf16.msra.mxu3 %v1178_v27  ;;  %v837_v27 = vld [vmem:[%s1542_s0 + $0x30] sm:$0xf0]  ;;  %v836_v32 = vor.u32 %v1143_v25, %v835_v24  ;;  %v867_v36 = vld [vmem:[%s1542_s0 + $0x50] sm:$0xf] }
  0x1e   :  { %641 = vmatpush.bf16.msra.mxu0 %v1153_v28  ;;  %v843_v28 = vld [vmem:[%s1542_s0 + $0x18] sm:$0xf]  ;;  %v840_v33 = vor.u32 %v1139_v26, %v837_v27  ;;  %v1151_v37 = vld [vmem:[%s1542_s0 + $0x6c] sm:$0xf0]  ;;  %v869_v39 = vld [vmem:[%s1542_s0 + $0x70] sm:$0xf0] }
  0x1f   :  { %660 = vmatpush.bf16.msra.mxu1 %v1161_v29  ;;  %v1144_v29 = vld [vmem:[%s1542_s0 + $0x34] sm:$0xf0] }
  0x20   :  { %679 = vmatpush.bf16.msra.mxu2 %v1169_v30  ;;  %v1140_v30 = vld [vmem:[%s1542_s0 + $0x1c] sm:$0xf]  ;;  %v844_v34 = vor.u32 %v1144_v29, %v843_v28 }
  0x21   :  { %698 = vmatpush.bf16.msra.mxu3 %v1177_v31  ;;  %642 = vmatmul.bf16.vlgmr.msra.gmra.mxu0 %v820_v42  ;;  %v845_v31 = vld [vmem:[%s1542_s0 + $0x38] sm:$0xf0] }
  0x22   :  { %710 = vmatpush.bf16.msrb.mxu0 %v1192_v41  ;;  %661 = vmatmul.bf16.vlgmr.msra.gmra.mxu1 %v824_v43  ;;  %v848_v35 = vor.u32 %v1140_v30, %v845_v31  ;;  %v1152_v41 = vld [vmem:[%s1542_s0 + $0x74] sm:$0xf0]  ;;  %v1148_v42 = vld [vmem:[%s1542_s0 + $0x5c] sm:$0xf] }
  0x23   :  { %680 = vmatmul.bf16.vlgmr.msra.gmra.mxu2 %v828_v44  ;;  %729 = vmatpush.bf16.msrb.mxu1 %v1200_v46  ;;  %v877_v43 = vld [vmem:[%s1542_s0 + $0x78] sm:$0xf0]  ;;  %v868_v44 = vor.u32 %v1151_v37, %v867_v36 }
  0x24   :  { %748 = vmatpush.bf16.msrb.mxu2 %v1208_v40  ;;  %699 = vmatmul.bf16.vlgmr.msra.gmra.mxu3 %v832_v45  ;;  %v875_v40 = vld [vmem:[%s1542_s0 + $0x58] sm:$0xf]  ;;  %v872_v45 = vor.u32 %v1147_v38, %v869_v39 }
  0x25   :  { %767 = vmatpush.bf16.msrb.mxu3 %v1216_v47  ;;  %v876_v46 = vor.u32 %v1152_v41, %v875_v40  ;;  %v880_v47 = vor.u32 %v1148_v42, %v877_v43 }
  0x26   :  { %711 = vmatpush.bf16.msrb.mxu0 %v1191_v49 }
  0x27   :  { %730 = vmatpush.bf16.msrb.mxu1 %v1199_v50 }
  0x28   :  { %749 = vmatpush.bf16.msrb.mxu2 %v1207_v48 }
  0x29   :  { %768 = vmatpush.bf16.msrb.mxu3 %v1215_v51 }
  0x2a   :  { %712 = vmatpush.bf16.msrb.mxu0 %v1190_v53 }
  0x2b   :  { %731 = vmatpush.bf16.msrb.mxu1 %v1198_v54 }
  0x2c   :  { %750 = vmatpush.bf16.msrb.mxu2 %v1206_v52 }
  0x2d   :  { %769 = vmatpush.bf16.msrb.mxu3 %v1214_v55 }
  0x2e   :  { %713 = vmatpush.bf16.msrb.mxu0 %v1189_v57 }
  0x2f   :  { %732 = vmatpush.bf16.msrb.mxu1 %v1197_v58 }
  0x30   :  { %751 = vmatpush.bf16.msrb.mxu2 %v1205_v56 }
  0x31   :  { %770 = vmatpush.bf16.msrb.mxu3 %v1213_v59  ;;  %647 = vmatmul.bf16.gmra.mxu0 %v852_v6 }
  0x32   :  { %714 = vmatpush.bf16.msrb.mxu0 %v1188_v5  ;;  %666 = vmatmul.bf16.gmra.mxu1 %v856_v7 }
  0x33   :  { %685 = vmatmul.bf16.gmra.mxu2 %v860_v8  ;;  %733 = vmatpush.bf16.msrb.mxu1 %v1196_v10 }
  0x34   :  { %752 = vmatpush.bf16.msrb.mxu2 %v1204_v4  ;;  %704 = vmatmul.bf16.gmra.mxu3 %v864_v9 }
  0x35   :  { %771 = vmatpush.bf16.msrb.mxu3 %v1212_v11 }
  0x36   :  { %715 = vmatpush.bf16.msrb.mxu0 %v1187_v13  ;;  %v1217_v13 = vld [vmem:[%s1543_s2] ss:$0 sm:$0xff] }
  0x37   :  { %734 = vmatpush.bf16.msrb.mxu1 %v1195_v14 }
  0x38   :  { %753 = vmatpush.bf16.msrb.mxu2 %v1203_v12 }
  0x39   :  { %772 = vmatpush.bf16.msrb.mxu3 %v1211_v15 }
  0x3a   :  { %716 = vmatpush.bf16.msrb.mxu0 %v1186_v17 }
  0x3b   :  { %735 = vmatpush.bf16.msrb.mxu1 %v1194_v18 }
  0x3c   :  { %754 = vmatpush.bf16.msrb.mxu2 %v1202_v16 }
  0x3d   :  { %773 = vmatpush.bf16.msrb.mxu3 %v1210_v19 }
  0x3e   :  { %717 = vmatpush.bf16.msrb.mxu0 %v1185_v21 }
  0x3f   :  { %736 = vmatpush.bf16.msrb.mxu1 %v1193_v22 }
  0x40   :  { %755 = vmatpush.bf16.msrb.mxu2 %v1201_v20 }
  0x41   :  { %774 = vmatpush.bf16.msrb.mxu3 %v1209_v23  ;;  %718 = vmatmul.bf16.vlgmr.msrb.gmra.mxu0 %v836_v32 }
  0x42   :  { %737 = vmatmul.bf16.vlgmr.msrb.gmra.mxu1 %v840_v33 }
  0x43   :  { %756 = vmatmul.bf16.vlgmr.msrb.gmra.mxu2 %v844_v34 }
  0x44   :  { %775 = vmatmul.bf16.vlgmr.msrb.gmra.mxu3 %v848_v35 }
  0x51   :  { %723 = vmatmul.bf16.gmra.mxu0 %v868_v44 }
  0x52   :  { %742 = vmatmul.bf16.gmra.mxu1 %v872_v45 }
  0x53   :  { %761 = vmatmul.bf16.gmra.mxu2 %v876_v46 }
  0x54   :  { %780 = vmatmul.bf16.gmra.mxu3 %v880_v47 }
  0x9e   :  { %v643_v48 = vpop.f32.mrf.mxu0 }
  0x9f   :  { %v662_v49 = vpop.f32.mrf.mxu1 }
  0xa0   :  { %v663_v62 = vadd.f32 %v662_v49, %v643_v48 }
  0xa6   :  { %v681_v50 = vpop.f32.mrf.mxu2  ;;  %v645_v52 = vpop.f32.mrf.mxu0 }
  0xa7   :  { %v700_v51 = vpop.f32.mrf.mxu3  ;;  %v664_v53 = vpop.f32.mrf.mxu1  ;;  %v682_v63 = vadd.f32 %v681_v50, %v663_v62 }
  0xa8   :  { %v665_v5 = vadd.f32 %v664_v53, %v645_v52 }
  0xa9   :  { %v701_v2 = vadd.f32 %v700_v51, %v682_v63 }
  0xae   :  { %v683_v54 = vpop.f32.mrf.mxu2  ;;  %v648_v56 = vpop.f32.mrf.mxu0 }
  0xaf   :  { %v702_v55 = vpop.f32.mrf.mxu3  ;;  %v667_v57 = vpop.f32.mrf.mxu1  ;;  %v684_v7 = vadd.f32 %v683_v54, %v665_v5 }
  0xb0   :  { %v668_v16 = vadd.f32 %v667_v57, %v648_v56 }
  0xb1   :  { %v703_v10 = vadd.f32 %v702_v55, %v684_v7 }
  0xb6   :  { %v686_v58 = vpop.f32.mrf.mxu2  ;;  %v650_v60 = vpop.f32.mrf.mxu0 }
  0xb7   :  { %v705_v59 = vpop.f32.mrf.mxu3  ;;  %v669_v61 = vpop.f32.mrf.mxu1  ;;  %v687_v19 = vadd.f32 %v686_v58, %v668_v16 }
  0xb8   :  { %v670_v27 = vadd.f32 %v669_v61, %v650_v60 }
  0xb9   :  { %v706_v23 = vadd.f32 %v705_v59, %v687_v19 }
  0xbe   :  { %v688_v0 = vpop.f32.mrf.mxu2  ;;  %v719_v3 = vpop.f32.mrf.mxu0 }
  0xbf   :  { %v707_v1 = vpop.f32.mrf.mxu3  ;;  %v738_v4 = vpop.f32.mrf.mxu1  ;;  %v720_v6 = vadd.f32 %v719_v3, %v701_v2  ;;  %v689_v31 = vadd.f32 %v688_v0, %v670_v27 }
  0xc1   :  { %v739_v8 = vadd.f32 %v738_v4, %v720_v6  ;;  %v708_v35 = vadd.f32 %v707_v1, %v689_v31 }
  0xc6   :  { %v757_v9 = vpop.f32.mrf.mxu2  ;;  %v721_v14 = vpop.f32.mrf.mxu0 }
  0xc7   :  { %v758_v11 = vadd.f32 %v757_v9, %v739_v8  ;;  %v776_v12 = vpop.f32.mrf.mxu3  ;;  %v740_v15 = vpop.f32.mrf.mxu1  ;;  %v722_v18 = vadd.f32 %v721_v14, %v703_v10 }
  0xc9   :  { %v777_v17 = vadd.f32 %v776_v12, %v758_v11  ;;  %v741_v21 = vadd.f32 %v740_v15, %v722_v18 }
  0xcb   :  { %v805_v20 = vadd.f32 %v1217_v13, %v777_v17 }
  0xcd   :  { %809 = vst [vmem:[%s1544_s3] sm:$0xff] %v805_v20 }
  0xce   :  { %v759_v22 = vpop.f32.mrf.mxu2  ;;  %v724_v26 = vpop.f32.mrf.mxu0 }
  0xcf   :  { %v760_v24 = vadd.f32 %v759_v22, %v741_v21  ;;  %v778_v25 = vpop.f32.mrf.mxu3  ;;  %v725_v29 = vadd.f32 %v724_v26, %v706_v23  ;;  %v743_v30 = vpop.f32.mrf.mxu1 }
  0xd1   :  { %v779_v28 = vadd.f32 %v778_v25, %v760_v24  ;;  %v744_v33 = vadd.f32 %v743_v30, %v725_v29 }
  0xd3   :  { %v806_v32 = vadd.f32 %v1217_v13, %v779_v28 }
  0xd5   :  { %810 = vst [vmem:[%s1544_s3 + $0x8] sm:$0xff] %v806_v32 }
  0xd6   :  { %v762_v34 = vpop.f32.mrf.mxu2  ;;  %v726_v38 = vpop.f32.mrf.mxu0 }
  0xd7   :  { %v763_v36 = vadd.f32 %v762_v34, %v744_v33  ;;  %v781_v37 = vpop.f32.mrf.mxu3  ;;  %v727_v40 = vadd.f32 %v726_v38, %v708_v35  ;;  %v745_v42 = vpop.f32.mrf.mxu1 }
  0xd9   :  { %v782_v39 = vadd.f32 %v781_v37, %v763_v36  ;;  %v746_v43 = vadd.f32 %v745_v42, %v727_v40 }
  0xdb   :  { %v807_v41 = vadd.f32 %v1217_v13, %v782_v39 }
  0xdd   :  { %811 = vst [vmem:[%s1544_s3 + $0x10] sm:$0xff] %v807_v41 }
  0xde   :  { %v764_v44 = vpop.f32.mrf.mxu2 }
  0xdf   :  { %v765_v45 = vadd.f32 %v764_v44, %v746_v43  ;;  %v783_v46 = vpop.f32.mrf.mxu3 }
  0xe1   :  { %v784_v47 = vadd.f32 %v783_v46, %v765_v45 }
  0xe3   :  { %v808_v48 = vadd.f32 %v1217_v13, %v784_v47 }
  0xe5   :  { %812 = vst [vmem:[%s1544_s3 + $0x18] sm:$0xff] %v808_v48 }

</bundles_post_ra>
